<compile_context>
chip_gen: v7x
topology: tpu7x:2x2x1
jax: 0.10.0
libtpu: 0.0.40
codegen_flags: <defaults>
</compile_context>

<pallas_src>
import jax
import jax.numpy as jnp
from jax.experimental import pallas as pl
from jax.experimental.pallas import tpu as pltpu

# ---------------- configuration (small shapes consistent with the module) ----
NTOKEN = 32
NINP = 32          # ninp == nhid so that tie_weights is shape-consistent
NHID = 32
NLAYERS = 2
CUTOFFS = [8, 16]                      # unique, increasing, < NTOKEN - 1
SHORTLIST = CUTOFFS[0]                 # 8
N_CLUSTERS = len(CUTOFFS)              # 2
HEAD_SIZE = SHORTLIST + N_CLUSTERS     # 10
# decoder (div_value = 2.0)
HSZ0, OSZ0 = NHID // 2, CUTOFFS[1] - CUTOFFS[0]   # 16, 8
HSZ1, OSZ1 = NHID // 4, NTOKEN - CUTOFFS[1]       # 8, 16

T = 8
B = 2

F32 = jnp.float32
BF16 = jnp.bfloat16


# ---------------------------------------------------------------------------
# Fully fused forward kernel:
#   adaptive-input embedding  ->  2-layer LSTM (wavefront)  ->  adaptive
#   log-softmax with loss.
# ---------------------------------------------------------------------------
def _fused_forward_kernel(tok_ref, tgt_ref, table_ref,
                          wih0_ref, whh0_ref, b0_ref,
                          wih1_ref, whh1_ref, b1_ref,
                          h0_ref, c0_ref,
                          wh_ref, w0a_ref, w0b_ref, w1a_ref, w1b_ref,
                          out_ref, loss_ref, hN_ref, cN_ref,
                          y_sc):
    n = tok_ref.shape[0]            # N = T * B rows (time-major, row = t*B + b)
    b = h0_ref.shape[1]             # batch
    h = h0_ref.shape[2]             # NHID
    nsteps = n // b                 # T

    # ---------------- adaptive-input embedding --------------------------------
    # Exact gather as a one-hot MXU matmul against the dense tied table
    # (head ∪ projected tails); one-hot selects a single row, so f32 result is
    # bit-exact w.r.t. a gather.
    tok = tok_ref[...]                                             # (N, 1) int32
    iota_v = jax.lax.broadcasted_iota(jnp.int32, (n, NTOKEN), 1)
    onehot = (iota_v == tok).astype(F32)                           # (N, NTOKEN)
    emb = jnp.dot(onehot, table_ref[...], preferred_element_type=F32)  # (N, NINP)

    # ---------------- AWD_LSTM stack (eval: all dropouts identity) ------------
    # Layer-0 input projection hoisted over all timesteps: one MXU matmul.
    gx0 = (jnp.dot(emb.astype(BF16), wih0_ref[...], preferred_element_type=F32)
           + b0_ref[...])                                          # (N, 4H) f32
    whh0 = whh0_ref[...]                                           # bf16 (H, 4H)
    wih1 = wih1_ref[...]
    whh1 = whh1_ref[...]
    b1 = b1_ref[...]                                               # f32 (1, 4H)

    def lstm_cell(gates, c_prev):
        # Full-vreg EUP pushes (one sigmoid + one tanh over the whole (B, 4H)
        # tile), then static quadrant slices.  PyTorch gate order: i, f, g, o.
        sig = jax.nn.sigmoid(gates)
        th = jnp.tanh(gates)
        ig = sig[:, 0 * h:1 * h]
        fg = sig[:, 1 * h:2 * h]
        gg = th[:, 2 * h:3 * h]
        og = sig[:, 3 * h:4 * h]
        c_new = fg * c_prev + ig * gg
        h_new = og * jnp.tanh(c_new)
        return h_new, c_new

    h_st = [h0_ref[0], h0_ref[1]]                                  # (B, H) f32
    c_st = [c0_ref[0], c0_ref[1]]
    h0_out = None                                                  # layer-0 h at time s-1

    # Wavefront over (layer, time): T + NLAYERS - 1 = 9 dependent steps instead
    # of NLAYERS*T = 16; layer-1 at time s-1 and layer-0 at time s are
    # independent within one wavefront step.
    # (Fine fully unrolled at T=8; switch to lax.fori_loop(unroll=True) at larger T.)
    for s in range(nsteps + 1):
        if s >= 1:                                   # layer 1, timestep s-1
            t = s - 1
            g1 = (jnp.dot(h0_out.astype(BF16), wih1, preferred_element_type=F32)
                  + jnp.dot(h_st[1].astype(BF16), whh1, preferred_element_type=F32)
                  + b1)
            h_st[1], c_st[1] = lstm_cell(g1, c_st[1])
            y_sc[t * b:(t + 1) * b, :] = h_st[1]     # stays in VMEM for the softmax
        if s < nsteps:                               # layer 0, timestep s
            g0 = gx0[s * b:(s + 1) * b, :] + jnp.dot(
                h_st[0].astype(BF16), whh0, preferred_element_type=F32)
            h_st[0], c_st[0] = lstm_cell(g0, c_st[0])
            h0_out = h_st[0]

    # Final states written once per layer.
    hN_ref[0] = h_st[0]
    hN_ref[1] = h_st[1]
    cN_ref[0] = c_st[0]
    cN_ref[1] = c_st[1]

    # ---------------- adaptive log-softmax with loss ---------------------------
    # Transposed orientation (classes on sublanes, rows on lanes); x is consumed
    # straight from VMEM scratch and the NHID contraction is expressed with
    # dot_general on both operands' last dim — no transpose anywhere.
    x = y_sc[...]                                   # (N, H) f32 last-layer hidden
    xb = x.astype(BF16)
    dn = (((1,), (1,)), ((), ()))                   # contract NHID of lhs and rhs

    def lsm0(z):                                    # log-softmax over class axis 0
        m = jnp.max(z, axis=0, keepdims=True)
        sft = z - m
        return sft - jnp.log(jnp.sum(jnp.exp(sft), axis=0, keepdims=True))

    head_lp = lsm0(jax.lax.dot_general(
        wh_ref[...].astype(BF16), xb, dn, preferred_element_type=F32))   # (HEAD, N)

    # Tails computed densely for all rows (fine at toy size); at real scale add
    # a row grid + scalar-prefetched cluster routing instead.
    h0t = jax.lax.dot_general(w0a_ref[...].astype(BF16), xb, dn,
                              preferred_element_type=F32)                # (HSZ0, N)
    t0_lp = lsm0(jnp.dot(w0b_ref[...].astype(BF16), h0t.astype(BF16),
                         preferred_element_type=F32))                    # (OSZ0, N)
    h1t = jax.lax.dot_general(w1a_ref[...].astype(BF16), xb, dn,
                              preferred_element_type=F32)                # (HSZ1, N)
    t1_lp = lsm0(jnp.dot(w1b_ref[...].astype(BF16), h1t.astype(BF16),
                         preferred_element_type=F32))                    # (OSZ1, N)

    tgt = tgt_ref[...]                              # (1, N) int32
    c0v, c1v = SHORTLIST, CUTOFFS[1]
    in_short = tgt < c0v
    in_cl0 = jnp.logical_and(tgt >= c0v, tgt < c1v)
    # head gather index: target itself (shortlist) or cluster id
    head_idx = jnp.where(in_short, tgt,
                         jnp.where(in_cl0, c0v, c0v + 1)).astype(jnp.int32)

    def gather0(lp, idx):                           # one class per column, sublane reduce
        io = jax.lax.broadcasted_iota(jnp.int32, lp.shape, 0)
        return jnp.sum(jnp.where(io == idx, lp, 0.0), axis=0, keepdims=True)

    out_row = gather0(head_lp, head_idx) + jnp.where(
        in_short, 0.0,
        jnp.where(in_cl0, gather0(t0_lp, tgt - c0v), gather0(t1_lp, tgt - c1v)))

    out_ref[...] = out_row                          # lane-dense (1, N) row store
    loss_ref[...] = jnp.sum(-out_row, axis=1, keepdims=True) * (1.0 / n)


# ---------------------------------------------------------------------------
# Parameters (deterministic synthetic init; shapes follow the module __init__).
# Weight tying: encoder.tail[i][0].weight == decoder.tail[i][1].weight (h2o),
#               encoder.tail[i][1].weight == decoder.tail[i][0].weight.T (i2h.T)
# ---------------------------------------------------------------------------
def init_params(key):
    ks = jax.random.split(key, 10)
    p = {}
    p['enc_head'] = 0.1 * jax.random.normal(ks[0], (SHORTLIST, NINP), F32)
    p['dec_head'] = 0.1 * jax.random.normal(ks[1], (HEAD_SIZE, NHID), F32)
    p['dec_t0_i2h'] = 0.1 * jax.random.normal(ks[2], (HSZ0, NHID), F32)   # (16,32)
    p['dec_t0_h2o'] = 0.1 * jax.random.normal(ks[3], (OSZ0, HSZ0), F32)   # (8,16)
    p['dec_t1_i2h'] = 0.1 * jax.random.normal(ks[4], (HSZ1, NHID), F32)   # (8,32)
    p['dec_t1_h2o'] = 0.1 * jax.random.normal(ks[5], (OSZ1, HSZ1), F32)   # (16,8)

    # Dense tied embedding table (AdaptiveInput with tied weights): rows
    # [0:8] = head embedding, [8:16] = h2o_0 @ i2h_0, [16:32] = h2o_1 @ i2h_1.
    # Constant at eval time -> precompute once, no per-forward glue ops.
    p['emb_table'] = jnp.concatenate(
        [p['enc_head'],
         p['dec_t0_h2o'] @ p['dec_t0_i2h'],
         p['dec_t1_h2o'] @ p['dec_t1_i2h']], axis=0).astype(F32)          # (NTOKEN, NINP)

    # AWD_LSTM weights (unit_forget_bias -> forget-gate bias = 1 in BOTH b_ih
    # and b_hh, so the combined bias carries 2.0 in the forget quadrant).
    for l in range(NLAYERS):
        din = NINP if l == 0 else NHID
        w_ih = 0.1 * jax.random.normal(ks[6 + 2 * l], (4 * NHID, din), F32)
        w_hh = 0.1 * jax.random.normal(ks[7 + 2 * l], (4 * NHID, NHID), F32)
        bias = jnp.zeros((4 * NHID,), F32).at[NHID:2 * NHID].set(2.0)     # b_ih + b_hh
        p[f'w_ih_t_{l}'] = w_ih.T.astype(BF16)     # x @ W_ih.T == x @ w_ih_t (bf16 MXU)
        p[f'w_hh_t_{l}'] = w_hh.T.astype(BF16)
        p[f'b_{l}'] = bias.reshape(1, 4 * NHID)
    return p


# ---------------------------------------------------------------------------
# Full forward pass (eval mode: emb/out/rnn/tail dropouts are identity).
# ---------------------------------------------------------------------------
@jax.jit
def model_forward(params, tokens, h0_stack, c0_stack, targets):
    t_, b_ = tokens.shape
    n = t_ * b_
    tok_col = tokens.reshape(n, 1).astype(jnp.int32)    # row = t*B + b (time-major)
    tgt_row = targets.reshape(1, n).astype(jnp.int32)

    # TODO(synk): train-mode VariationalDropout / DropConnect / emb-out-tail
    # dropouts (stochastic) omitted; eval-mode forward is deterministic and all
    # dropout layers are identity.
    # TODO(synk): h0/c0 could be input_output_aliased to hN/cN to drop one
    # output allocation; skipped to keep the call maximally portable.
    out_row, loss11, h_n, c_n = pl.pallas_call(
        _fused_forward_kernel,
        out_shape=[jax.ShapeDtypeStruct((1, n), F32),                 # per-row logprob
                   jax.ShapeDtypeStruct((1, 1), F32),                 # loss
                   jax.ShapeDtypeStruct((NLAYERS, b_, NHID), F32),    # h_n
                   jax.ShapeDtypeStruct((NLAYERS, b_, NHID), F32)],   # c_n
        scratch_shapes=[pltpu.VMEM((n, NHID), F32)],                  # last-layer h per row
    )(tok_col, tgt_row, params['emb_table'],
      params['w_ih_t_0'], params['w_hh_t_0'], params['b_0'],
      params['w_ih_t_1'], params['w_hh_t_1'], params['b_1'],
      h0_stack, c0_stack,
      params['dec_head'],
      params['dec_t0_i2h'], params['dec_t0_h2o'],
      params['dec_t1_i2h'], params['dec_t1_h2o'])

    return out_row[0], (h_n, c_n), loss11[0, 0]


if __name__ == "__main__":
    key = jax.random.PRNGKey(0)
    k_par, k_tok, k_tgt = jax.random.split(key, 3)

    params = init_params(k_par)
    tokens = jax.random.randint(k_tok, (T, B), 0, NTOKEN, dtype=jnp.int32)
    targets = jax.random.randint(k_tgt, (T * B,), 0, NTOKEN, dtype=jnp.int32)
    # init_hidden(bsz): zeros (nlayers, B, nhid) for both h and c
    h0 = jnp.zeros((NLAYERS, B, NHID), F32)
    c0 = jnp.zeros((NLAYERS, B, NHID), F32)

    output, (h_n, c_n), loss = model_forward(params, tokens, h0, c0, targets)
    jax.block_until_ready((output, h_n, c_n, loss))

    assert output.shape == (T * B,)
    assert h_n.shape == (NLAYERS, B, NHID) and c_n.shape == (NLAYERS, B, NHID)
    assert bool(jnp.isfinite(output).all()) and bool(jnp.isfinite(loss))
    assert bool(jnp.isfinite(h_n).all()) and bool(jnp.isfinite(c_n).all())
    print("KERNEL_OK")
</pallas_src>

<mosaic_0001>
module attributes {stable_mosaic.version = 11 : i64} {
  func.func @_fused_forward_kernel(%arg0: memref<16x1xi32, #tpu.memory_space<vmem>>, %arg1: memref<1x16xi32, #tpu.memory_space<vmem>>, %arg2: memref<32x32xf32, #tpu.memory_space<vmem>>, %arg3: memref<32x128xbf16, #tpu.memory_space<vmem>>, %arg4: memref<32x128xbf16, #tpu.memory_space<vmem>>, %arg5: memref<1x128xf32, #tpu.memory_space<vmem>>, %arg6: memref<32x128xbf16, #tpu.memory_space<vmem>>, %arg7: memref<32x128xbf16, #tpu.memory_space<vmem>>, %arg8: memref<1x128xf32, #tpu.memory_space<vmem>>, %arg9: memref<2x2x32xf32, #tpu.memory_space<vmem>>, %arg10: memref<2x2x32xf32, #tpu.memory_space<vmem>>, %arg11: memref<10x32xf32, #tpu.memory_space<vmem>>, %arg12: memref<16x32xf32, #tpu.memory_space<vmem>>, %arg13: memref<8x16xf32, #tpu.memory_space<vmem>>, %arg14: memref<8x32xf32, #tpu.memory_space<vmem>>, %arg15: memref<16x8xf32, #tpu.memory_space<vmem>>, %arg16: memref<1x16xf32, #tpu.memory_space<vmem>>, %arg17: memref<1x1xf32, #tpu.memory_space<vmem>>, %arg18: memref<2x2x32xf32, #tpu.memory_space<vmem>>, %arg19: memref<2x2x32xf32, #tpu.memory_space<vmem>>, %arg20: memref<16x32xf32, #tpu.memory_space<vmem>>) attributes {dimension_semantics = [], scalar_prefetch = 0 : i64, scratch_operands = 1 : i64, tpu.core_type = #tpu.core_type<tc>} {
    %c0 = arith.constant 0 : index
    %c0_0 = arith.constant 0 : index
    %0 = vector.load %arg0[%c0, %c0_0] : memref<16x1xi32, #tpu.memory_space<vmem>>, vector<16x1xi32>
    %1 = tpu.iota {dimensions = array<i32: 1>} : vector<16x32xi32>
    %2 = vector.broadcast %0 : vector<16x1xi32> to vector<16x32xi32>
    %3 = arith.cmpi eq, %1, %2 : vector<16x32xi32>
    %4 = arith.extui %3 : vector<16x32xi1> to vector<16x32xi32>
    %5 = arith.sitofp %4 : vector<16x32xi32> to vector<16x32xf32>
    %c0_1 = arith.constant 0 : index
    %c0_2 = arith.constant 0 : index
    %6 = vector.load %arg2[%c0_1, %c0_2] : memref<32x32xf32, #tpu.memory_space<vmem>>, vector<32x32xf32>
    %cst = arith.constant dense<0.000000e+00> : vector<16x32xf32>
    %7 = tpu.matmul %5, %6, %cst {dimension_numbers = #tpu.dot_dimension_numbers<[1], [0], [0], [1], [0, 0, 1, 1], [], []>} : vector<16x32xf32>, vector<32x32xf32>, vector<16x32xf32> -> vector<16x32xf32>
    %8 = arith.truncf %7 : vector<16x32xf32> to vector<16x32xbf16>
    %c0_3 = arith.constant 0 : index
    %c0_4 = arith.constant 0 : index
    %9 = vector.load %arg3[%c0_3, %c0_4] : memref<32x128xbf16, #tpu.memory_space<vmem>>, vector<32x128xbf16>
    %cst_5 = arith.constant dense<0.000000e+00> : vector<16x128xf32>
    %10 = tpu.matmul %8, %9, %cst_5 {dimension_numbers = #tpu.dot_dimension_numbers<[1], [0], [0], [1], [0, 0, 1, 1], [], []>} : vector<16x32xbf16>, vector<32x128xbf16>, vector<16x128xf32> -> vector<16x128xf32>
    %c0_6 = arith.constant 0 : index
    %c0_7 = arith.constant 0 : index
    %11 = vector.load %arg5[%c0_6, %c0_7] : memref<1x128xf32, #tpu.memory_space<vmem>>, vector<1x128xf32>
    %12 = vector.broadcast %11 : vector<1x128xf32> to vector<16x128xf32>
    %13 = arith.addf %10, %12 : vector<16x128xf32>
    %c0_8 = arith.constant 0 : index
    %c0_9 = arith.constant 0 : index
    %14 = vector.load %arg4[%c0_8, %c0_9] : memref<32x128xbf16, #tpu.memory_space<vmem>>, vector<32x128xbf16>
    %c0_10 = arith.constant 0 : index
    %c0_11 = arith.constant 0 : index
    %15 = vector.load %arg6[%c0_10, %c0_11] : memref<32x128xbf16, #tpu.memory_space<vmem>>, vector<32x128xbf16>
    %c0_12 = arith.constant 0 : index
    %c0_13 = arith.constant 0 : index
    %16 = vector.load %arg7[%c0_12, %c0_13] : memref<32x128xbf16, #tpu.memory_space<vmem>>, vector<32x128xbf16>
    %c0_14 = arith.constant 0 : index
    %c0_15 = arith.constant 0 : index
    %17 = vector.load %arg8[%c0_14, %c0_15] : memref<1x128xf32, #tpu.memory_space<vmem>>, vector<1x128xf32>
    %c0_16 = arith.constant 0 : index
    %c0_17 = arith.constant 0 : index
    %c0_18 = arith.constant 0 : index
    %18 = vector.load %arg9[%c0_16, %c0_17, %c0_18] : memref<2x2x32xf32, #tpu.memory_space<vmem>>, vector<1x2x32xf32>
    %19 = vector.shape_cast %18 : vector<1x2x32xf32> to vector<2x32xf32>
    %c1 = arith.constant 1 : index
    %c0_19 = arith.constant 0 : index
    %c0_20 = arith.constant 0 : index
    %20 = vector.load %arg9[%c1, %c0_19, %c0_20] : memref<2x2x32xf32, #tpu.memory_space<vmem>>, vector<1x2x32xf32>
    %21 = vector.shape_cast %20 : vector<1x2x32xf32> to vector<2x32xf32>
    %c0_21 = arith.constant 0 : index
    %c0_22 = arith.constant 0 : index
    %c0_23 = arith.constant 0 : index
    %22 = vector.load %arg10[%c0_21, %c0_22, %c0_23] : memref<2x2x32xf32, #tpu.memory_space<vmem>>, vector<1x2x32xf32>
    %23 = vector.shape_cast %22 : vector<1x2x32xf32> to vector<2x32xf32>
    %c1_24 = arith.constant 1 : index
    %c0_25 = arith.constant 0 : index
    %c0_26 = arith.constant 0 : index
    %24 = vector.load %arg10[%c1_24, %c0_25, %c0_26] : memref<2x2x32xf32, #tpu.memory_space<vmem>>, vector<1x2x32xf32>
    %25 = vector.shape_cast %24 : vector<1x2x32xf32> to vector<2x32xf32>
    %26 = vector.extract_strided_slice %13 {offsets = [0, 0], sizes = [2, 128], strides = [1, 1]} : vector<16x128xf32> to vector<2x128xf32>
    %27 = arith.truncf %19 : vector<2x32xf32> to vector<2x32xbf16>
    %cst_27 = arith.constant dense<0.000000e+00> : vector<2x128xf32>
    %28 = tpu.matmul %27, %14, %cst_27 {dimension_numbers = #tpu.dot_dimension_numbers<[1], [0], [0], [1], [0, 0, 1, 1], [], []>} : vector<2x32xbf16>, vector<32x128xbf16>, vector<2x128xf32> -> vector<2x128xf32>
    %29 = arith.addf %26, %28 : vector<2x128xf32>
    %30 = arith.negf %29 : vector<2x128xf32>
    %31 = math.exp %30 : vector<2x128xf32>
    %cst_28 = arith.constant 1.000000e+00 : f32
    %32 = vector.broadcast %cst_28 : f32 to vector<2x128xf32>
    %33 = arith.addf %32, %31 : vector<2x128xf32>
    %34 = arith.divf %32, %33 : vector<2x128xf32>
    %35 = math.tanh %29 : vector<2x128xf32>
    %36 = vector.extract_strided_slice %34 {offsets = [0, 0], sizes = [2, 32], strides = [1, 1]} : vector<2x128xf32> to vector<2x32xf32>
    %37 = vector.extract_strided_slice %34 {offsets = [0, 32], sizes = [2, 32], strides = [1, 1]} : vector<2x128xf32> to vector<2x32xf32>
    %38 = vector.extract_strided_slice %35 {offsets = [0, 64], sizes = [2, 32], strides = [1, 1]} : vector<2x128xf32> to vector<2x32xf32>
    %39 = vector.extract_strided_slice %34 {offsets = [0, 96], sizes = [2, 32], strides = [1, 1]} : vector<2x128xf32> to vector<2x32xf32>
    %40 = arith.mulf %37, %23 : vector<2x32xf32>
    %41 = arith.mulf %36, %38 : vector<2x32xf32>
    %42 = arith.addf %40, %41 : vector<2x32xf32>
    %43 = math.tanh %42 : vector<2x32xf32>
    %44 = arith.mulf %39, %43 : vector<2x32xf32>
    %45 = arith.truncf %44 : vector<2x32xf32> to vector<2x32xbf16>
    %cst_29 = arith.constant dense<0.000000e+00> : vector<2x128xf32>
    %46 = tpu.matmul %45, %15, %cst_29 {dimension_numbers = #tpu.dot_dimension_numbers<[1], [0], [0], [1], [0, 0, 1, 1], [], []>} : vector<2x32xbf16>, vector<32x128xbf16>, vector<2x128xf32> -> vector<2x128xf32>
    %47 = arith.truncf %21 : vector<2x32xf32> to vector<2x32xbf16>
    %cst_30 = arith.constant dense<0.000000e+00> : vector<2x128xf32>
    %48 = tpu.matmul %47, %16, %cst_30 {dimension_numbers = #tpu.dot_dimension_numbers<[1], [0], [0], [1], [0, 0, 1, 1], [], []>} : vector<2x32xbf16>, vector<32x128xbf16>, vector<2x128xf32> -> vector<2x128xf32>
    %49 = arith.addf %46, %48 : vector<2x128xf32>
    %50 = vector.broadcast %17 : vector<1x128xf32> to vector<2x128xf32>
    %51 = arith.addf %49, %50 : vector<2x128xf32>
    %52 = arith.negf %51 : vector<2x128xf32>
    %53 = math.exp %52 : vector<2x128xf32>
    %cst_31 = arith.constant 1.000000e+00 : f32
    %54 = vector.broadcast %cst_31 : f32 to vector<2x128xf32>
    %55 = arith.addf %54, %53 : vector<2x128xf32>
    %56 = arith.divf %54, %55 : vector<2x128xf32>
    %57 = math.tanh %51 : vector<2x128xf32>
    %58 = vector.extract_strided_slice %56 {offsets = [0, 0], sizes = [2, 32], strides = [1, 1]} : vector<2x128xf32> to vector<2x32xf32>
    %59 = vector.extract_strided_slice %56 {offsets = [0, 32], sizes = [2, 32], strides = [1, 1]} : vector<2x128xf32> to vector<2x32xf32>
    %60 = vector.extract_strided_slice %57 {offsets = [0, 64], sizes = [2, 32], strides = [1, 1]} : vector<2x128xf32> to vector<2x32xf32>
    %61 = vector.extract_strided_slice %56 {offsets = [0, 96], sizes = [2, 32], strides = [1, 1]} : vector<2x128xf32> to vector<2x32xf32>
    %62 = arith.mulf %59, %25 : vector<2x32xf32>
    %63 = arith.mulf %58, %60 : vector<2x32xf32>
    %64 = arith.addf %62, %63 : vector<2x32xf32>
    %65 = math.tanh %64 : vector<2x32xf32>
    %66 = arith.mulf %61, %65 : vector<2x32xf32>
    %c0_32 = arith.constant 0 : index
    %c0_33 = arith.constant 0 : index
    %67 = vector.load %arg20[%c0_32, %c0_33] : memref<16x32xf32, #tpu.memory_space<vmem>>, vector<2x32xf32>
    tpu.vector_store %arg20[%c0_32, %c0_33], %66 {strides = array<i32>} : memref<16x32xf32, #tpu.memory_space<vmem>>, vector<2x32xf32>,
    %68 = vector.extract_strided_slice %13 {offsets = [2, 0], sizes = [2, 128], strides = [1, 1]} : vector<16x128xf32> to vector<2x128xf32>
    %69 = arith.truncf %44 : vector<2x32xf32> to vector<2x32xbf16>
    %cst_34 = arith.constant dense<0.000000e+00> : vector<2x128xf32>
    %70 = tpu.matmul %69, %14, %cst_34 {dimension_numbers = #tpu.dot_dimension_numbers<[1], [0], [0], [1], [0, 0, 1, 1], [], []>} : vector<2x32xbf16>, vector<32x128xbf16>, vector<2x128xf32> -> vector<2x128xf32>
    %71 = arith.addf %68, %70 : vector<2x128xf32>
    %72 = arith.negf %71 : vector<2x128xf32>
    %73 = math.exp %72 : vector<2x128xf32>
    %cst_35 = arith.constant 1.000000e+00 : f32
    %74 = vector.broadcast %cst_35 : f32 to vector<2x128xf32>
    %75 = arith.addf %74, %73 : vector<2x128xf32>
    %76 = arith.divf %74, %75 : vector<2x128xf32>
    %77 = math.tanh %71 : vector<2x128xf32>
    %78 = vector.extract_strided_slice %76 {offsets = [0, 0], sizes = [2, 32], strides = [1, 1]} : vector<2x128xf32> to vector<2x32xf32>
    %79 = vector.extract_strided_slice %76 {offsets = [0, 32], sizes = [2, 32], strides = [1, 1]} : vector<2x128xf32> to vector<2x32xf32>
    %80 = vector.extract_strided_slice %77 {offsets = [0, 64], sizes = [2, 32], strides = [1, 1]} : vector<2x128xf32> to vector<2x32xf32>
    %81 = vector.extract_strided_slice %76 {offsets = [0, 96], sizes = [2, 32], strides = [1, 1]} : vector<2x128xf32> to vector<2x32xf32>
    %82 = arith.mulf %79, %42 : vector<2x32xf32>
    %83 = arith.mulf %78, %80 : vector<2x32xf32>
    %84 = arith.addf %82, %83 : vector<2x32xf32>
    %85 = math.tanh %84 : vector<2x32xf32>
    %86 = arith.mulf %81, %85 : vector<2x32xf32>
    %87 = arith.truncf %86 : vector<2x32xf32> to vector<2x32xbf16>
    %cst_36 = arith.constant dense<0.000000e+00> : vector<2x128xf32>
    %88 = tpu.matmul %87, %15, %cst_36 {dimension_numbers = #tpu.dot_dimension_numbers<[1], [0], [0], [1], [0, 0, 1, 1], [], []>} : vector<2x32xbf16>, vector<32x128xbf16>, vector<2x128xf32> -> vector<2x128xf32>
    %89 = arith.truncf %66 : vector<2x32xf32> to vector<2x32xbf16>
    %cst_37 = arith.constant dense<0.000000e+00> : vector<2x128xf32>
    %90 = tpu.matmul %89, %16, %cst_37 {dimension_numbers = #tpu.dot_dimension_numbers<[1], [0], [0], [1], [0, 0, 1, 1], [], []>} : vector<2x32xbf16>, vector<32x128xbf16>, vector<2x128xf32> -> vector<2x128xf32>
    %91 = arith.addf %88, %90 : vector<2x128xf32>
    %92 = vector.broadcast %17 : vector<1x128xf32> to vector<2x128xf32>
    %93 = arith.addf %91, %92 : vector<2x128xf32>
    %94 = arith.negf %93 : vector<2x128xf32>
    %95 = math.exp %94 : vector<2x128xf32>
    %cst_38 = arith.constant 1.000000e+00 : f32
    %96 = vector.broadcast %cst_38 : f32 to vector<2x128xf32>
    %97 = arith.addf %96, %95 : vector<2x128xf32>
    %98 = arith.divf %96, %97 : vector<2x128xf32>
    %99 = math.tanh %93 : vector<2x128xf32>
    %100 = vector.extract_strided_slice %98 {offsets = [0, 0], sizes = [2, 32], strides = [1, 1]} : vector<2x128xf32> to vector<2x32xf32>
    %101 = vector.extract_strided_slice %98 {offsets = [0, 32], sizes = [2, 32], strides = [1, 1]} : vector<2x128xf32> to vector<2x32xf32>
    %102 = vector.extract_strided_slice %99 {offsets = [0, 64], sizes = [2, 32], strides = [1, 1]} : vector<2x128xf32> to vector<2x32xf32>
    %103 = vector.extract_strided_slice %98 {offsets = [0, 96], sizes = [2, 32], strides = [1, 1]} : vector<2x128xf32> to vector<2x32xf32>
    %104 = arith.mulf %101, %64 : vector<2x32xf32>
    %105 = arith.mulf %100, %102 : vector<2x32xf32>
    %106 = arith.addf %104, %105 : vector<2x32xf32>
    %107 = math.tanh %106 : vector<2x32xf32>
    %108 = arith.mulf %103, %107 : vector<2x32xf32>
    %c2 = arith.constant 2 : index
    %c0_39 = arith.constant 0 : index
    %109 = vector.load %arg20[%c2, %c0_39] : memref<16x32xf32, #tpu.memory_space<vmem>>, vector<2x32xf32>
    tpu.vector_store %arg20[%c2, %c0_39], %108 {strides = array<i32>} : memref<16x32xf32, #tpu.memory_space<vmem>>, vector<2x32xf32>,
    %110 = vector.extract_strided_slice %13 {offsets = [4, 0], sizes = [2, 128], strides = [1, 1]} : vector<16x128xf32> to vector<2x128xf32>
    %111 = arith.truncf %86 : vector<2x32xf32> to vector<2x32xbf16>
    %cst_40 = arith.constant dense<0.000000e+00> : vector<2x128xf32>
    %112 = tpu.matmul %111, %14, %cst_40 {dimension_numbers = #tpu.dot_dimension_numbers<[1], [0], [0], [1], [0, 0, 1, 1], [], []>} : vector<2x32xbf16>, vector<32x128xbf16>, vector<2x128xf32> -> vector<2x128xf32>
    %113 = arith.addf %110, %112 : vector<2x128xf32>
    %114 = arith.negf %113 : vector<2x128xf32>
    %115 = math.exp %114 : vector<2x128xf32>
    %cst_41 = arith.constant 1.000000e+00 : f32
    %116 = vector.broadcast %cst_41 : f32 to vector<2x128xf32>
    %117 = arith.addf %116, %115 : vector<2x128xf32>
    %118 = arith.divf %116, %117 : vector<2x128xf32>
    %119 = math.tanh %113 : vector<2x128xf32>
    %120 = vector.extract_strided_slice %118 {offsets = [0, 0], sizes = [2, 32], strides = [1, 1]} : vector<2x128xf32> to vector<2x32xf32>
    %121 = vector.extract_strided_slice %118 {offsets = [0, 32], sizes = [2, 32], strides = [1, 1]} : vector<2x128xf32> to vector<2x32xf32>
    %122 = vector.extract_strided_slice %119 {offsets = [0, 64], sizes = [2, 32], strides = [1, 1]} : vector<2x128xf32> to vector<2x32xf32>
    %123 = vector.extract_strided_slice %118 {offsets = [0, 96], sizes = [2, 32], strides = [1, 1]} : vector<2x128xf32> to vector<2x32xf32>
    %124 = arith.mulf %121, %84 : vector<2x32xf32>
    %125 = arith.mulf %120, %122 : vector<2x32xf32>
    %126 = arith.addf %124, %125 : vector<2x32xf32>
    %127 = math.tanh %126 : vector<2x32xf32>
    %128 = arith.mulf %123, %127 : vector<2x32xf32>
    %129 = arith.truncf %128 : vector<2x32xf32> to vector<2x32xbf16>
    %cst_42 = arith.constant dense<0.000000e+00> : vector<2x128xf32>
    %130 = tpu.matmul %129, %15, %cst_42 {dimension_numbers = #tpu.dot_dimension_numbers<[1], [0], [0], [1], [0, 0, 1, 1], [], []>} : vector<2x32xbf16>, vector<32x128xbf16>, vector<2x128xf32> -> vector<2x128xf32>
    %131 = arith.truncf %108 : vector<2x32xf32> to vector<2x32xbf16>
    %cst_43 = arith.constant dense<0.000000e+00> : vector<2x128xf32>
    %132 = tpu.matmul %131, %16, %cst_43 {dimension_numbers = #tpu.dot_dimension_numbers<[1], [0], [0], [1], [0, 0, 1, 1], [], []>} : vector<2x32xbf16>, vector<32x128xbf16>, vector<2x128xf32> -> vector<2x128xf32>
    %133 = arith.addf %130, %132 : vector<2x128xf32>
    %134 = vector.broadcast %17 : vector<1x128xf32> to vector<2x128xf32>
    %135 = arith.addf %133, %134 : vector<2x128xf32>
    %136 = arith.negf %135 : vector<2x128xf32>
    %137 = math.exp %136 : vector<2x128xf32>
    %cst_44 = arith.constant 1.000000e+00 : f32
    %138 = vector.broadcast %cst_44 : f32 to vector<2x128xf32>
    %139 = arith.addf %138, %137 : vector<2x128xf32>
    %140 = arith.divf %138, %139 : vector<2x128xf32>
    %141 = math.tanh %135 : vector<2x128xf32>
    %142 = vector.extract_strided_slice %140 {offsets = [0, 0], sizes = [2, 32], strides = [1, 1]} : vector<2x128xf32> to vector<2x32xf32>
    %143 = vector.extract_strided_slice %140 {offsets = [0, 32], sizes = [2, 32], strides = [1, 1]} : vector<2x128xf32> to vector<2x32xf32>
    %144 = vector.extract_strided_slice %141 {offsets = [0, 64], sizes = [2, 32], strides = [1, 1]} : vector<2x128xf32> to vector<2x32xf32>
    %145 = vector.extract_strided_slice %140 {offsets = [0, 96], sizes = [2, 32], strides = [1, 1]} : vector<2x128xf32> to vector<2x32xf32>
    %146 = arith.mulf %143, %106 : vector<2x32xf32>
    %147 = arith.mulf %142, %144 : vector<2x32xf32>
    %148 = arith.addf %146, %147 : vector<2x32xf32>
    %149 = math.tanh %148 : vector<2x32xf32>
    %150 = arith.mulf %145, %149 : vector<2x32xf32>
    %c4 = arith.constant 4 : index
    %c0_45 = arith.constant 0 : index
    %151 = vector.load %arg20[%c4, %c0_45] : memref<16x32xf32, #tpu.memory_space<vmem>>, vector<2x32xf32>
    tpu.vector_store %arg20[%c4, %c0_45], %150 {strides = array<i32>} : memref<16x32xf32, #tpu.memory_space<vmem>>, vector<2x32xf32>,
    %152 = vector.extract_strided_slice %13 {offsets = [6, 0], sizes = [2, 128], strides = [1, 1]} : vector<16x128xf32> to vector<2x128xf32>
    %153 = arith.truncf %128 : vector<2x32xf32> to vector<2x32xbf16>
    %cst_46 = arith.constant dense<0.000000e+00> : vector<2x128xf32>
    %154 = tpu.matmul %153, %14, %cst_46 {dimension_numbers = #tpu.dot_dimension_numbers<[1], [0], [0], [1], [0, 0, 1, 1], [], []>} : vector<2x32xbf16>, vector<32x128xbf16>, vector<2x128xf32> -> vector<2x128xf32>
    %155 = arith.addf %152, %154 : vector<2x128xf32>
    %156 = arith.negf %155 : vector<2x128xf32>
    %157 = math.exp %156 : vector<2x128xf32>
    %cst_47 = arith.constant 1.000000e+00 : f32
    %158 = vector.broadcast %cst_47 : f32 to vector<2x128xf32>
    %159 = arith.addf %158, %157 : vector<2x128xf32>
    %160 = arith.divf %158, %159 : vector<2x128xf32>
    %161 = math.tanh %155 : vector<2x128xf32>
    %162 = vector.extract_strided_slice %160 {offsets = [0, 0], sizes = [2, 32], strides = [1, 1]} : vector<2x128xf32> to vector<2x32xf32>
    %163 = vector.extract_strided_slice %160 {offsets = [0, 32], sizes = [2, 32], strides = [1, 1]} : vector<2x128xf32> to vector<2x32xf32>
    %164 = vector.extract_strided_slice %161 {offsets = [0, 64], sizes = [2, 32], strides = [1, 1]} : vector<2x128xf32> to vector<2x32xf32>
    %165 = vector.extract_strided_slice %160 {offsets = [0, 96], sizes = [2, 32], strides = [1, 1]} : vector<2x128xf32> to vector<2x32xf32>
    %166 = arith.mulf %163, %126 : vector<2x32xf32>
    %167 = arith.mulf %162, %164 : vector<2x32xf32>
    %168 = arith.addf %166, %167 : vector<2x32xf32>
    %169 = math.tanh %168 : vector<2x32xf32>
    %170 = arith.mulf %165, %169 : vector<2x32xf32>
    %171 = arith.truncf %170 : vector<2x32xf32> to vector<2x32xbf16>
    %cst_48 = arith.constant dense<0.000000e+00> : vector<2x128xf32>
    %172 = tpu.matmul %171, %15, %cst_48 {dimension_numbers = #tpu.dot_dimension_numbers<[1], [0], [0], [1], [0, 0, 1, 1], [], []>} : vector<2x32xbf16>, vector<32x128xbf16>, vector<2x128xf32> -> vector<2x128xf32>
    %173 = arith.truncf %150 : vector<2x32xf32> to vector<2x32xbf16>
    %cst_49 = arith.constant dense<0.000000e+00> : vector<2x128xf32>
    %174 = tpu.matmul %173, %16, %cst_49 {dimension_numbers = #tpu.dot_dimension_numbers<[1], [0], [0], [1], [0, 0, 1, 1], [], []>} : vector<2x32xbf16>, vector<32x128xbf16>, vector<2x128xf32> -> vector<2x128xf32>
    %175 = arith.addf %172, %174 : vector<2x128xf32>
    %176 = vector.broadcast %17 : vector<1x128xf32> to vector<2x128xf32>
    %177 = arith.addf %175, %176 : vector<2x128xf32>
    %178 = arith.negf %177 : vector<2x128xf32>
    %179 = math.exp %178 : vector<2x128xf32>
    %cst_50 = arith.constant 1.000000e+00 : f32
    %180 = vector.broadcast %cst_50 : f32 to vector<2x128xf32>
    %181 = arith.addf %180, %179 : vector<2x128xf32>
    %182 = arith.divf %180, %181 : vector<2x128xf32>
    %183 = math.tanh %177 : vector<2x128xf32>
    %184 = vector.extract_strided_slice %182 {offsets = [0, 0], sizes = [2, 32], strides = [1, 1]} : vector<2x128xf32> to vector<2x32xf32>
    %185 = vector.extract_strided_slice %182 {offsets = [0, 32], sizes = [2, 32], strides = [1, 1]} : vector<2x128xf32> to vector<2x32xf32>
    %186 = vector.extract_strided_slice %183 {offsets = [0, 64], sizes = [2, 32], strides = [1, 1]} : vector<2x128xf32> to vector<2x32xf32>
    %187 = vector.extract_strided_slice %182 {offsets = [0, 96], sizes = [2, 32], strides = [1, 1]} : vector<2x128xf32> to vector<2x32xf32>
    %188 = arith.mulf %185, %148 : vector<2x32xf32>
    %189 = arith.mulf %184, %186 : vector<2x32xf32>
    %190 = arith.addf %188, %189 : vector<2x32xf32>
    %191 = math.tanh %190 : vector<2x32xf32>
    %192 = arith.mulf %187, %191 : vector<2x32xf32>
    %c6 = arith.constant 6 : index
    %c0_51 = arith.constant 0 : index
    %193 = vector.load %arg20[%c6, %c0_51] : memref<16x32xf32, #tpu.memory_space<vmem>>, vector<2x32xf32>
    tpu.vector_store %arg20[%c6, %c0_51], %192 {strides = array<i32>} : memref<16x32xf32, #tpu.memory_space<vmem>>, vector<2x32xf32>,
    %194 = vector.extract_strided_slice %13 {offsets = [8, 0], sizes = [2, 128], strides = [1, 1]} : vector<16x128xf32> to vector<2x128xf32>
    %195 = arith.truncf %170 : vector<2x32xf32> to vector<2x32xbf16>
    %cst_52 = arith.constant dense<0.000000e+00> : vector<2x128xf32>
    %196 = tpu.matmul %195, %14, %cst_52 {dimension_numbers = #tpu.dot_dimension_numbers<[1], [0], [0], [1], [0, 0, 1, 1], [], []>} : vector<2x32xbf16>, vector<32x128xbf16>, vector<2x128xf32> -> vector<2x128xf32>
    %197 = arith.addf %194, %196 : vector<2x128xf32>
    %198 = arith.negf %197 : vector<2x128xf32>
    %199 = math.exp %198 : vector<2x128xf32>
    %cst_53 = arith.constant 1.000000e+00 : f32
    %200 = vector.broadcast %cst_53 : f32 to vector<2x128xf32>
    %201 = arith.addf %200, %199 : vector<2x128xf32>
    %202 = arith.divf %200, %201 : vector<2x128xf32>
    %203 = math.tanh %197 : vector<2x128xf32>
    %204 = vector.extract_strided_slice %202 {offsets = [0, 0], sizes = [2, 32], strides = [1, 1]} : vector<2x128xf32> to vector<2x32xf32>
    %205 = vector.extract_strided_slice %202 {offsets = [0, 32], sizes = [2, 32], strides = [1, 1]} : vector<2x128xf32> to vector<2x32xf32>
    %206 = vector.extract_strided_slice %203 {offsets = [0, 64], sizes = [2, 32], strides = [1, 1]} : vector<2x128xf32> to vector<2x32xf32>
    %207 = vector.extract_strided_slice %202 {offsets = [0, 96], sizes = [2, 32], strides = [1, 1]} : vector<2x128xf32> to vector<2x32xf32>
    %208 = arith.mulf %205, %168 : vector<2x32xf32>
    %209 = arith.mulf %204, %206 : vector<2x32xf32>
    %210 = arith.addf %208, %209 : vector<2x32xf32>
    %211 = math.tanh %210 : vector<2x32xf32>
    %212 = arith.mulf %207, %211 : vector<2x32xf32>
    %213 = arith.truncf %212 : vector<2x32xf32> to vector<2x32xbf16>
    %cst_54 = arith.constant dense<0.000000e+00> : vector<2x128xf32>
    %214 = tpu.matmul %213, %15, %cst_54 {dimension_numbers = #tpu.dot_dimension_numbers<[1], [0], [0], [1], [0, 0, 1, 1], [], []>} : vector<2x32xbf16>, vector<32x128xbf16>, vector<2x128xf32> -> vector<2x128xf32>
    %215 = arith.truncf %192 : vector<2x32xf32> to vector<2x32xbf16>
    %cst_55 = arith.constant dense<0.000000e+00> : vector<2x128xf32>
    %216 = tpu.matmul %215, %16, %cst_55 {dimension_numbers = #tpu.dot_dimension_numbers<[1], [0], [0], [1], [0, 0, 1, 1], [], []>} : vector<2x32xbf16>, vector<32x128xbf16>, vector<2x128xf32> -> vector<2x128xf32>
    %217 = arith.addf %214, %216 : vector<2x128xf32>
    %218 = vector.broadcast %17 : vector<1x128xf32> to vector<2x128xf32>
    %219 = arith.addf %217, %218 : vector<2x128xf32>
    %220 = arith.negf %219 : vector<2x128xf32>
    %221 = math.exp %220 : vector<2x128xf32>
    %cst_56 = arith.constant 1.000000e+00 : f32
    %222 = vector.broadcast %cst_56 : f32 to vector<2x128xf32>
    %223 = arith.addf %222, %221 : vector<2x128xf32>
    %224 = arith.divf %222, %223 : vector<2x128xf32>
    %225 = math.tanh %219 : vector<2x128xf32>
    %226 = vector.extract_strided_slice %224 {offsets = [0, 0], sizes = [2, 32], strides = [1, 1]} : vector<2x128xf32> to vector<2x32xf32>
    %227 = vector.extract_strided_slice %224 {offsets = [0, 32], sizes = [2, 32], strides = [1, 1]} : vector<2x128xf32> to vector<2x32xf32>
    %228 = vector.extract_strided_slice %225 {offsets = [0, 64], sizes = [2, 32], strides = [1, 1]} : vector<2x128xf32> to vector<2x32xf32>
    %229 = vector.extract_strided_slice %224 {offsets = [0, 96], sizes = [2, 32], strides = [1, 1]} : vector<2x128xf32> to vector<2x32xf32>
    %230 = arith.mulf %227, %190 : vector<2x32xf32>
    %231 = arith.mulf %226, %228 : vector<2x32xf32>
    %232 = arith.addf %230, %231 : vector<2x32xf32>
    %233 = math.tanh %232 : vector<2x32xf32>
    %234 = arith.mulf %229, %233 : vector<2x32xf32>
    %c8 = arith.constant 8 : index
    %c0_57 = arith.constant 0 : index
    %235 = vector.load %arg20[%c8, %c0_57] : memref<16x32xf32, #tpu.memory_space<vmem>>, vector<2x32xf32>
    tpu.vector_store %arg20[%c8, %c0_57], %234 {strides = array<i32>} : memref<16x32xf32, #tpu.memory_space<vmem>>, vector<2x32xf32>,
    %236 = vector.extract_strided_slice %13 {offsets = [10, 0], sizes = [2, 128], strides = [1, 1]} : vector<16x128xf32> to vector<2x128xf32>
    %237 = arith.truncf %212 : vector<2x32xf32> to vector<2x32xbf16>
    %cst_58 = arith.constant dense<0.000000e+00> : vector<2x128xf32>
    %238 = tpu.matmul %237, %14, %cst_58 {dimension_numbers = #tpu.dot_dimension_numbers<[1], [0], [0], [1], [0, 0, 1, 1], [], []>} : vector<2x32xbf16>, vector<32x128xbf16>, vector<2x128xf32> -> vector<2x128xf32>
    %239 = arith.addf %236, %238 : vector<2x128xf32>
    %240 = arith.negf %239 : vector<2x128xf32>
    %241 = math.exp %240 : vector<2x128xf32>
    %cst_59 = arith.constant 1.000000e+00 : f32
    %242 = vector.broadcast %cst_59 : f32 to vector<2x128xf32>
    %243 = arith.addf %242, %241 : vector<2x128xf32>
    %244 = arith.divf %242, %243 : vector<2x128xf32>
    %245 = math.tanh %239 : vector<2x128xf32>
    %246 = vector.extract_strided_slice %244 {offsets = [0, 0], sizes = [2, 32], strides = [1, 1]} : vector<2x128xf32> to vector<2x32xf32>
    %247 = vector.extract_strided_slice %244 {offsets = [0, 32], sizes = [2, 32], strides = [1, 1]} : vector<2x128xf32> to vector<2x32xf32>
    %248 = vector.extract_strided_slice %245 {offsets = [0, 64], sizes = [2, 32], strides = [1, 1]} : vector<2x128xf32> to vector<2x32xf32>
    %249 = vector.extract_strided_slice %244 {offsets = [0, 96], sizes = [2, 32], strides = [1, 1]} : vector<2x128xf32> to vector<2x32xf32>
    %250 = arith.mulf %247, %210 : vector<2x32xf32>
    %251 = arith.mulf %246, %248 : vector<2x32xf32>
    %252 = arith.addf %250, %251 : vector<2x32xf32>
    %253 = math.tanh %252 : vector<2x32xf32>
    %254 = arith.mulf %249, %253 : vector<2x32xf32>
    %255 = arith.truncf %254 : vector<2x32xf32> to vector<2x32xbf16>
    %cst_60 = arith.constant dense<0.000000e+00> : vector<2x128xf32>
    %256 = tpu.matmul %255, %15, %cst_60 {dimension_numbers = #tpu.dot_dimension_numbers<[1], [0], [0], [1], [0, 0, 1, 1], [], []>} : vector<2x32xbf16>, vector<32x128xbf16>, vector<2x128xf32> -> vector<2x128xf32>
    %257 = arith.truncf %234 : vector<2x32xf32> to vector<2x32xbf16>
    %cst_61 = arith.constant dense<0.000000e+00> : vector<2x128xf32>
    %258 = tpu.matmul %257, %16, %cst_61 {dimension_numbers = #tpu.dot_dimension_numbers<[1], [0], [0], [1], [0, 0, 1, 1], [], []>} : vector<2x32xbf16>, vector<32x128xbf16>, vector<2x128xf32> -> vector<2x128xf32>
    %259 = arith.addf %256, %258 : vector<2x128xf32>
    %260 = vector.broadcast %17 : vector<1x128xf32> to vector<2x128xf32>
    %261 = arith.addf %259, %260 : vector<2x128xf32>
    %262 = arith.negf %261 : vector<2x128xf32>
    %263 = math.exp %262 : vector<2x128xf32>
    %cst_62 = arith.constant 1.000000e+00 : f32
    %264 = vector.broadcast %cst_62 : f32 to vector<2x128xf32>
    %265 = arith.addf %264, %263 : vector<2x128xf32>
    %266 = arith.divf %264, %265 : vector<2x128xf32>
    %267 = math.tanh %261 : vector<2x128xf32>
    %268 = vector.extract_strided_slice %266 {offsets = [0, 0], sizes = [2, 32], strides = [1, 1]} : vector<2x128xf32> to vector<2x32xf32>
    %269 = vector.extract_strided_slice %266 {offsets = [0, 32], sizes = [2, 32], strides = [1, 1]} : vector<2x128xf32> to vector<2x32xf32>
    %270 = vector.extract_strided_slice %267 {offsets = [0, 64], sizes = [2, 32], strides = [1, 1]} : vector<2x128xf32> to vector<2x32xf32>
    %271 = vector.extract_strided_slice %266 {offsets = [0, 96], sizes = [2, 32], strides = [1, 1]} : vector<2x128xf32> to vector<2x32xf32>
    %272 = arith.mulf %269, %232 : vector<2x32xf32>
    %273 = arith.mulf %268, %270 : vector<2x32xf32>
    %274 = arith.addf %272, %273 : vector<2x32xf32>
    %275 = math.tanh %274 : vector<2x32xf32>
    %276 = arith.mulf %271, %275 : vector<2x32xf32>
    %c10 = arith.constant 10 : index
    %c0_63 = arith.constant 0 : index
    %277 = vector.load %arg20[%c10, %c0_63] : memref<16x32xf32, #tpu.memory_space<vmem>>, vector<2x32xf32>
    tpu.vector_store %arg20[%c10, %c0_63], %276 {strides = array<i32>} : memref<16x32xf32, #tpu.memory_space<vmem>>, vector<2x32xf32>,
    %278 = vector.extract_strided_slice %13 {offsets = [12, 0], sizes = [2, 128], strides = [1, 1]} : vector<16x128xf32> to vector<2x128xf32>
    %279 = arith.truncf %254 : vector<2x32xf32> to vector<2x32xbf16>
    %cst_64 = arith.constant dense<0.000000e+00> : vector<2x128xf32>
    %280 = tpu.matmul %279, %14, %cst_64 {dimension_numbers = #tpu.dot_dimension_numbers<[1], [0], [0], [1], [0, 0, 1, 1], [], []>} : vector<2x32xbf16>, vector<32x128xbf16>, vector<2x128xf32> -> vector<2x128xf32>
    %281 = arith.addf %278, %280 : vector<2x128xf32>
    %282 = arith.negf %281 : vector<2x128xf32>
    %283 = math.exp %282 : vector<2x128xf32>
    %cst_65 = arith.constant 1.000000e+00 : f32
    %284 = vector.broadcast %cst_65 : f32 to vector<2x128xf32>
    %285 = arith.addf %284, %283 : vector<2x128xf32>
    %286 = arith.divf %284, %285 : vector<2x128xf32>
    %287 = math.tanh %281 : vector<2x128xf32>
    %288 = vector.extract_strided_slice %286 {offsets = [0, 0], sizes = [2, 32], strides = [1, 1]} : vector<2x128xf32> to vector<2x32xf32>
    %289 = vector.extract_strided_slice %286 {offsets = [0, 32], sizes = [2, 32], strides = [1, 1]} : vector<2x128xf32> to vector<2x32xf32>
    %290 = vector.extract_strided_slice %287 {offsets = [0, 64], sizes = [2, 32], strides = [1, 1]} : vector<2x128xf32> to vector<2x32xf32>
    %291 = vector.extract_strided_slice %286 {offsets = [0, 96], sizes = [2, 32], strides = [1, 1]} : vector<2x128xf32> to vector<2x32xf32>
    %292 = arith.mulf %289, %252 : vector<2x32xf32>
    %293 = arith.mulf %288, %290 : vector<2x32xf32>
    %294 = arith.addf %292, %293 : vector<2x32xf32>
    %295 = math.tanh %294 : vector<2x32xf32>
    %296 = arith.mulf %291, %295 : vector<2x32xf32>
    %297 = arith.truncf %296 : vector<2x32xf32> to vector<2x32xbf16>
    %cst_66 = arith.constant dense<0.000000e+00> : vector<2x128xf32>
    %298 = tpu.matmul %297, %15, %cst_66 {dimension_numbers = #tpu.dot_dimension_numbers<[1], [0], [0], [1], [0, 0, 1, 1], [], []>} : vector<2x32xbf16>, vector<32x128xbf16>, vector<2x128xf32> -> vector<2x128xf32>
    %299 = arith.truncf %276 : vector<2x32xf32> to vector<2x32xbf16>
    %cst_67 = arith.constant dense<0.000000e+00> : vector<2x128xf32>
    %300 = tpu.matmul %299, %16, %cst_67 {dimension_numbers = #tpu.dot_dimension_numbers<[1], [0], [0], [1], [0, 0, 1, 1], [], []>} : vector<2x32xbf16>, vector<32x128xbf16>, vector<2x128xf32> -> vector<2x128xf32>
    %301 = arith.addf %298, %300 : vector<2x128xf32>
    %302 = vector.broadcast %17 : vector<1x128xf32> to vector<2x128xf32>
    %303 = arith.addf %301, %302 : vector<2x128xf32>
    %304 = arith.negf %303 : vector<2x128xf32>
    %305 = math.exp %304 : vector<2x128xf32>
    %cst_68 = arith.constant 1.000000e+00 : f32
    %306 = vector.broadcast %cst_68 : f32 to vector<2x128xf32>
    %307 = arith.addf %306, %305 : vector<2x128xf32>
    %308 = arith.divf %306, %307 : vector<2x128xf32>
    %309 = math.tanh %303 : vector<2x128xf32>
    %310 = vector.extract_strided_slice %308 {offsets = [0, 0], sizes = [2, 32], strides = [1, 1]} : vector<2x128xf32> to vector<2x32xf32>
    %311 = vector.extract_strided_slice %308 {offsets = [0, 32], sizes = [2, 32], strides = [1, 1]} : vector<2x128xf32> to vector<2x32xf32>
    %312 = vector.extract_strided_slice %309 {offsets = [0, 64], sizes = [2, 32], strides = [1, 1]} : vector<2x128xf32> to vector<2x32xf32>
    %313 = vector.extract_strided_slice %308 {offsets = [0, 96], sizes = [2, 32], strides = [1, 1]} : vector<2x128xf32> to vector<2x32xf32>
    %314 = arith.mulf %311, %274 : vector<2x32xf32>
    %315 = arith.mulf %310, %312 : vector<2x32xf32>
    %316 = arith.addf %314, %315 : vector<2x32xf32>
    %317 = math.tanh %316 : vector<2x32xf32>
    %318 = arith.mulf %313, %317 : vector<2x32xf32>
    %c12 = arith.constant 12 : index
    %c0_69 = arith.constant 0 : index
    %319 = vector.load %arg20[%c12, %c0_69] : memref<16x32xf32, #tpu.memory_space<vmem>>, vector<2x32xf32>
    tpu.vector_store %arg20[%c12, %c0_69], %318 {strides = array<i32>} : memref<16x32xf32, #tpu.memory_space<vmem>>, vector<2x32xf32>,
    %320 = vector.extract_strided_slice %13 {offsets = [14, 0], sizes = [2, 128], strides = [1, 1]} : vector<16x128xf32> to vector<2x128xf32>
    %321 = arith.truncf %296 : vector<2x32xf32> to vector<2x32xbf16>
    %cst_70 = arith.constant dense<0.000000e+00> : vector<2x128xf32>
    %322 = tpu.matmul %321, %14, %cst_70 {dimension_numbers = #tpu.dot_dimension_numbers<[1], [0], [0], [1], [0, 0, 1, 1], [], []>} : vector<2x32xbf16>, vector<32x128xbf16>, vector<2x128xf32> -> vector<2x128xf32>
    %323 = arith.addf %320, %322 : vector<2x128xf32>
    %324 = arith.negf %323 : vector<2x128xf32>
    %325 = math.exp %324 : vector<2x128xf32>
    %cst_71 = arith.constant 1.000000e+00 : f32
    %326 = vector.broadcast %cst_71 : f32 to vector<2x128xf32>
    %327 = arith.addf %326, %325 : vector<2x128xf32>
    %328 = arith.divf %326, %327 : vector<2x128xf32>
    %329 = math.tanh %323 : vector<2x128xf32>
    %330 = vector.extract_strided_slice %328 {offsets = [0, 0], sizes = [2, 32], strides = [1, 1]} : vector<2x128xf32> to vector<2x32xf32>
    %331 = vector.extract_strided_slice %328 {offsets = [0, 32], sizes = [2, 32], strides = [1, 1]} : vector<2x128xf32> to vector<2x32xf32>
    %332 = vector.extract_strided_slice %329 {offsets = [0, 64], sizes = [2, 32], strides = [1, 1]} : vector<2x128xf32> to vector<2x32xf32>
    %333 = vector.extract_strided_slice %328 {offsets = [0, 96], sizes = [2, 32], strides = [1, 1]} : vector<2x128xf32> to vector<2x32xf32>
    %334 = arith.mulf %331, %294 : vector<2x32xf32>
    %335 = arith.mulf %330, %332 : vector<2x32xf32>
    %336 = arith.addf %334, %335 : vector<2x32xf32>
    %337 = math.tanh %336 : vector<2x32xf32>
    %338 = arith.mulf %333, %337 : vector<2x32xf32>
    %339 = arith.truncf %338 : vector<2x32xf32> to vector<2x32xbf16>
    %cst_72 = arith.constant dense<0.000000e+00> : vector<2x128xf32>
    %340 = tpu.matmul %339, %15, %cst_72 {dimension_numbers = #tpu.dot_dimension_numbers<[1], [0], [0], [1], [0, 0, 1, 1], [], []>} : vector<2x32xbf16>, vector<32x128xbf16>, vector<2x128xf32> -> vector<2x128xf32>
    %341 = arith.truncf %318 : vector<2x32xf32> to vector<2x32xbf16>
    %cst_73 = arith.constant dense<0.000000e+00> : vector<2x128xf32>
    %342 = tpu.matmul %341, %16, %cst_73 {dimension_numbers = #tpu.dot_dimension_numbers<[1], [0], [0], [1], [0, 0, 1, 1], [], []>} : vector<2x32xbf16>, vector<32x128xbf16>, vector<2x128xf32> -> vector<2x128xf32>
    %343 = arith.addf %340, %342 : vector<2x128xf32>
    %344 = vector.broadcast %17 : vector<1x128xf32> to vector<2x128xf32>
    %345 = arith.addf %343, %344 : vector<2x128xf32>
    %346 = arith.negf %345 : vector<2x128xf32>
    %347 = math.exp %346 : vector<2x128xf32>
    %cst_74 = arith.constant 1.000000e+00 : f32
    %348 = vector.broadcast %cst_74 : f32 to vector<2x128xf32>
    %349 = arith.addf %348, %347 : vector<2x128xf32>
    %350 = arith.divf %348, %349 : vector<2x128xf32>
    %351 = math.tanh %345 : vector<2x128xf32>
    %352 = vector.extract_strided_slice %350 {offsets = [0, 0], sizes = [2, 32], strides = [1, 1]} : vector<2x128xf32> to vector<2x32xf32>
    %353 = vector.extract_strided_slice %350 {offsets = [0, 32], sizes = [2, 32], strides = [1, 1]} : vector<2x128xf32> to vector<2x32xf32>
    %354 = vector.extract_strided_slice %351 {offsets = [0, 64], sizes = [2, 32], strides = [1, 1]} : vector<2x128xf32> to vector<2x32xf32>
    %355 = vector.extract_strided_slice %350 {offsets = [0, 96], sizes = [2, 32], strides = [1, 1]} : vector<2x128xf32> to vector<2x32xf32>
    %356 = arith.mulf %353, %316 : vector<2x32xf32>
    %357 = arith.mulf %352, %354 : vector<2x32xf32>
    %358 = arith.addf %356, %357 : vector<2x32xf32>
    %359 = math.tanh %358 : vector<2x32xf32>
    %360 = arith.mulf %355, %359 : vector<2x32xf32>
    %c14 = arith.constant 14 : index
    %c0_75 = arith.constant 0 : index
    %361 = vector.load %arg20[%c14, %c0_75] : memref<16x32xf32, #tpu.memory_space<vmem>>, vector<2x32xf32>
    tpu.vector_store %arg20[%c14, %c0_75], %360 {strides = array<i32>} : memref<16x32xf32, #tpu.memory_space<vmem>>, vector<2x32xf32>,
    %c0_76 = arith.constant 0 : index
    %c0_77 = arith.constant 0 : index
    %c0_78 = arith.constant 0 : index
    %362 = vector.load %arg18[%c0_76, %c0_77, %c0_78] : memref<2x2x32xf32, #tpu.memory_space<vmem>>, vector<1x2x32xf32>
    %363 = vector.shape_cast %362 : vector<1x2x32xf32> to vector<2x32xf32>
    %364 = vector.shape_cast %338 : vector<2x32xf32> to vector<1x2x32xf32>
    tpu.vector_store %arg18[%c0_76, %c0_77, %c0_78], %364 {strides = array<i32>} : memref<2x2x32xf32, #tpu.memory_space<vmem>>, vector<1x2x32xf32>,
    %c1_79 = arith.constant 1 : index
    %c0_80 = arith.constant 0 : index
    %c0_81 = arith.constant 0 : index
    %365 = vector.load %arg18[%c1_79, %c0_80, %c0_81] : memref<2x2x32xf32, #tpu.memory_space<vmem>>, vector<1x2x32xf32>
    %366 = vector.shape_cast %365 : vector<1x2x32xf32> to vector<2x32xf32>
    %367 = vector.shape_cast %360 : vector<2x32xf32> to vector<1x2x32xf32>
    tpu.vector_store %arg18[%c1_79, %c0_80, %c0_81], %367 {strides = array<i32>} : memref<2x2x32xf32, #tpu.memory_space<vmem>>, vector<1x2x32xf32>,
    %c0_82 = arith.constant 0 : index
    %c0_83 = arith.constant 0 : index
    %c0_84 = arith.constant 0 : index
    %368 = vector.load %arg19[%c0_82, %c0_83, %c0_84] : memref<2x2x32xf32, #tpu.memory_space<vmem>>, vector<1x2x32xf32>
    %369 = vector.shape_cast %368 : vector<1x2x32xf32> to vector<2x32xf32>
    %370 = vector.shape_cast %336 : vector<2x32xf32> to vector<1x2x32xf32>
    tpu.vector_store %arg19[%c0_82, %c0_83, %c0_84], %370 {strides = array<i32>} : memref<2x2x32xf32, #tpu.memory_space<vmem>>, vector<1x2x32xf32>,
    %c1_85 = arith.constant 1 : index
    %c0_86 = arith.constant 0 : index
    %c0_87 = arith.constant 0 : index
    %371 = vector.load %arg19[%c1_85, %c0_86, %c0_87] : memref<2x2x32xf32, #tpu.memory_space<vmem>>, vector<1x2x32xf32>
    %372 = vector.shape_cast %371 : vector<1x2x32xf32> to vector<2x32xf32>
    %373 = vector.shape_cast %358 : vector<2x32xf32> to vector<1x2x32xf32>
    tpu.vector_store %arg19[%c1_85, %c0_86, %c0_87], %373 {strides = array<i32>} : memref<2x2x32xf32, #tpu.memory_space<vmem>>, vector<1x2x32xf32>,
    %c0_88 = arith.constant 0 : index
    %c0_89 = arith.constant 0 : index
    %374 = vector.load %arg20[%c0_88, %c0_89] : memref<16x32xf32, #tpu.memory_space<vmem>>, vector<16x32xf32>
    %375 = arith.truncf %374 : vector<16x32xf32> to vector<16x32xbf16>
    %c0_90 = arith.constant 0 : index
    %c0_91 = arith.constant 0 : index
    %376 = vector.load %arg11[%c0_90, %c0_91] : memref<10x32xf32, #tpu.memory_space<vmem>>, vector<10x32xf32>
    %377 = arith.truncf %376 : vector<10x32xf32> to vector<10x32xbf16>
    %cst_92 = arith.constant dense<0.000000e+00> : vector<10x16xf32>
    %378 = tpu.matmul %377, %375, %cst_92 {dimension_numbers = #tpu.dot_dimension_numbers<[1], [1], [0], [0], [0, 0, 1, 0], [], []>} : vector<10x32xbf16>, vector<16x32xbf16>, vector<10x16xf32> -> vector<10x16xf32>
    %cst_93 = arith.constant dense<0xFF800000> : vector<16xf32>
    %379 = vector.multi_reduction <maximumf>, %378, %cst_93 [0] : vector<10x16xf32> to vector<16xf32>
    %380 = vector.shape_cast %379 : vector<16xf32> to vector<1x16xf32>
    %381 = vector.broadcast %380 : vector<1x16xf32> to vector<10x16xf32>
    %382 = arith.subf %378, %381 : vector<10x16xf32>
    %383 = math.exp %382 : vector<10x16xf32>
    %cst_94 = arith.constant dense<0.000000e+00> : vector<16xf32>
    %384 = vector.multi_reduction <add>, %383, %cst_94 [0] : vector<10x16xf32> to vector<16xf32>
    %385 = vector.shape_cast %384 : vector<16xf32> to vector<1x16xf32>
    %386 = math.log %385 : vector<1x16xf32>
    %387 = vector.broadcast %386 : vector<1x16xf32> to vector<10x16xf32>
    %388 = arith.subf %382, %387 : vector<10x16xf32>
    %c0_95 = arith.constant 0 : index
    %c0_96 = arith.constant 0 : index
    %389 = vector.load %arg12[%c0_95, %c0_96] : memref<16x32xf32, #tpu.memory_space<vmem>>, vector<16x32xf32>
    %390 = arith.truncf %389 : vector<16x32xf32> to vector<16x32xbf16>
    %cst_97 = arith.constant dense<0.000000e+00> : vector<16x16xf32>
    %391 = tpu.matmul %390, %375, %cst_97 {dimension_numbers = #tpu.dot_dimension_numbers<[1], [1], [0], [0], [0, 0, 1, 0], [], []>} : vector<16x32xbf16>, vector<16x32xbf16>, vector<16x16xf32> -> vector<16x16xf32>
    %c0_98 = arith.constant 0 : index
    %c0_99 = arith.constant 0 : index
    %392 = vector.load %arg13[%c0_98, %c0_99] : memref<8x16xf32, #tpu.memory_space<vmem>>, vector<8x16xf32>
    %393 = arith.truncf %392 : vector<8x16xf32> to vector<8x16xbf16>
    %394 = arith.truncf %391 : vector<16x16xf32> to vector<16x16xbf16>
    %cst_100 = arith.constant dense<0.000000e+00> : vector<8x16xf32>
    %395 = tpu.matmul %393, %394, %cst_100 {dimension_numbers = #tpu.dot_dimension_numbers<[1], [0], [0], [1], [0, 0, 1, 1], [], []>} : vector<8x16xbf16>, vector<16x16xbf16>, vector<8x16xf32> -> vector<8x16xf32>
    %cst_101 = arith.constant dense<0xFF800000> : vector<16xf32>
    %396 = vector.multi_reduction <maximumf>, %395, %cst_101 [0] : vector<8x16xf32> to vector<16xf32>
    %397 = vector.shape_cast %396 : vector<16xf32> to vector<1x16xf32>
    %398 = vector.broadcast %397 : vector<1x16xf32> to vector<8x16xf32>
    %399 = arith.subf %395, %398 : vector<8x16xf32>
    %400 = math.exp %399 : vector<8x16xf32>
    %cst_102 = arith.constant dense<0.000000e+00> : vector<16xf32>
    %401 = vector.multi_reduction <add>, %400, %cst_102 [0] : vector<8x16xf32> to vector<16xf32>
    %402 = vector.shape_cast %401 : vector<16xf32> to vector<1x16xf32>
    %403 = math.log %402 : vector<1x16xf32>
    %404 = vector.broadcast %403 : vector<1x16xf32> to vector<8x16xf32>
    %405 = arith.subf %399, %404 : vector<8x16xf32>
    %c0_103 = arith.constant 0 : index
    %c0_104 = arith.constant 0 : index
    %406 = vector.load %arg14[%c0_103, %c0_104] : memref<8x32xf32, #tpu.memory_space<vmem>>, vector<8x32xf32>
    %407 = arith.truncf %406 : vector<8x32xf32> to vector<8x32xbf16>
    %cst_105 = arith.constant dense<0.000000e+00> : vector<8x16xf32>
    %408 = tpu.matmul %407, %375, %cst_105 {dimension_numbers = #tpu.dot_dimension_numbers<[1], [1], [0], [0], [0, 0, 1, 0], [], []>} : vector<8x32xbf16>, vector<16x32xbf16>, vector<8x16xf32> -> vector<8x16xf32>
    %c0_106 = arith.constant 0 : index
    %c0_107 = arith.constant 0 : index
    %409 = vector.load %arg15[%c0_106, %c0_107] : memref<16x8xf32, #tpu.memory_space<vmem>>, vector<16x8xf32>
    %410 = arith.truncf %409 : vector<16x8xf32> to vector<16x8xbf16>
    %411 = arith.truncf %408 : vector<8x16xf32> to vector<8x16xbf16>
    %cst_108 = arith.constant dense<0.000000e+00> : vector<16x16xf32>
    %412 = tpu.matmul %410, %411, %cst_108 {dimension_numbers = #tpu.dot_dimension_numbers<[1], [0], [0], [1], [0, 0, 1, 1], [], []>} : vector<16x8xbf16>, vector<8x16xbf16>, vector<16x16xf32> -> vector<16x16xf32>
    %cst_109 = arith.constant dense<0xFF800000> : vector<16xf32>
    %413 = vector.multi_reduction <maximumf>, %412, %cst_109 [0] : vector<16x16xf32> to vector<16xf32>
    %414 = vector.shape_cast %413 : vector<16xf32> to vector<1x16xf32>
    %415 = vector.broadcast %414 : vector<1x16xf32> to vector<16x16xf32>
    %416 = arith.subf %412, %415 : vector<16x16xf32>
    %417 = math.exp %416 : vector<16x16xf32>
    %cst_110 = arith.constant dense<0.000000e+00> : vector<16xf32>
    %418 = vector.multi_reduction <add>, %417, %cst_110 [0] : vector<16x16xf32> to vector<16xf32>
    %419 = vector.shape_cast %418 : vector<16xf32> to vector<1x16xf32>
    %420 = math.log %419 : vector<1x16xf32>
    %421 = vector.broadcast %420 : vector<1x16xf32> to vector<16x16xf32>
    %422 = arith.subf %416, %421 : vector<16x16xf32>
    %c0_111 = arith.constant 0 : index
    %c0_112 = arith.constant 0 : index
    %423 = vector.load %arg1[%c0_111, %c0_112] : memref<1x16xi32, #tpu.memory_space<vmem>>, vector<1x16xi32>
    %c8_i32 = arith.constant 8 : i32
    %424 = vector.broadcast %c8_i32 : i32 to vector<1x16xi32>
    %425 = arith.cmpi slt, %423, %424 : vector<1x16xi32>
    %c8_i32_113 = arith.constant 8 : i32
    %426 = vector.broadcast %c8_i32_113 : i32 to vector<1x16xi32>
    %427 = arith.cmpi sge, %423, %426 : vector<1x16xi32>
    %c16_i32 = arith.constant 16 : i32
    %428 = vector.broadcast %c16_i32 : i32 to vector<1x16xi32>
    %429 = arith.cmpi slt, %423, %428 : vector<1x16xi32>
    %430 = arith.andi %427, %429 : vector<1x16xi1>
    %c8_i32_114 = arith.constant 8 : i32
    %c9_i32 = arith.constant 9 : i32
    %431 = vector.broadcast %c8_i32_114 : i32 to vector<1x16xi32>
    %432 = vector.broadcast %c9_i32 : i32 to vector<1x16xi32>
    %433 = arith.select %430, %431, %432 : vector<1x16xi1>, vector<1x16xi32>
    %434 = arith.select %425, %423, %433 : vector<1x16xi1>, vector<1x16xi32>
    %435 = tpu.iota {dimensions = array<i32: 0>} : vector<10x16xi32>
    %436 = vector.broadcast %434 : vector<1x16xi32> to vector<10x16xi32>
    %437 = arith.cmpi eq, %435, %436 : vector<10x16xi32>
    %cst_115 = arith.constant 0.000000e+00 : f32
    %438 = vector.broadcast %cst_115 : f32 to vector<10x16xf32>
    %439 = arith.select %437, %388, %438 : vector<10x16xi1>, vector<10x16xf32>
    %cst_116 = arith.constant dense<0.000000e+00> : vector<16xf32>
    %440 = vector.multi_reduction <add>, %439, %cst_116 [0] : vector<10x16xf32> to vector<16xf32>
    %441 = vector.shape_cast %440 : vector<16xf32> to vector<1x16xf32>
    %c8_i32_117 = arith.constant 8 : i32
    %442 = vector.broadcast %c8_i32_117 : i32 to vector<1x16xi32>
    %443 = arith.subi %423, %442 : vector<1x16xi32>
    %444 = tpu.iota {dimensions = array<i32: 0>} : vector<8x16xi32>
    %445 = vector.broadcast %443 : vector<1x16xi32> to vector<8x16xi32>
    %446 = arith.cmpi eq, %444, %445 : vector<8x16xi32>
    %cst_118 = arith.constant 0.000000e+00 : f32
    %447 = vector.broadcast %cst_118 : f32 to vector<8x16xf32>
    %448 = arith.select %446, %405, %447 : vector<8x16xi1>, vector<8x16xf32>
    %cst_119 = arith.constant dense<0.000000e+00> : vector<16xf32>
    %449 = vector.multi_reduction <add>, %448, %cst_119 [0] : vector<8x16xf32> to vector<16xf32>
    %450 = vector.shape_cast %449 : vector<16xf32> to vector<1x16xf32>
    %c16_i32_120 = arith.constant 16 : i32
    %451 = vector.broadcast %c16_i32_120 : i32 to vector<1x16xi32>
    %452 = arith.subi %423, %451 : vector<1x16xi32>
    %453 = tpu.iota {dimensions = array<i32: 0>} : vector<16x16xi32>
    %454 = vector.broadcast %452 : vector<1x16xi32> to vector<16x16xi32>
    %455 = arith.cmpi eq, %453, %454 : vector<16x16xi32>
    %cst_121 = arith.constant 0.000000e+00 : f32
    %456 = vector.broadcast %cst_121 : f32 to vector<16x16xf32>
    %457 = arith.select %455, %422, %456 : vector<16x16xi1>, vector<16x16xf32>
    %cst_122 = arith.constant dense<0.000000e+00> : vector<16xf32>
    %458 = vector.multi_reduction <add>, %457, %cst_122 [0] : vector<16x16xf32> to vector<16xf32>
    %459 = vector.shape_cast %458 : vector<16xf32> to vector<1x16xf32>
    %460 = arith.select %430, %450, %459 : vector<1x16xi1>, vector<1x16xf32>
    %cst_123 = arith.constant 0.000000e+00 : f32
    %461 = vector.broadcast %cst_123 : f32 to vector<1x16xf32>
    %462 = arith.select %425, %461, %460 : vector<1x16xi1>, vector<1x16xf32>
    %463 = arith.addf %441, %462 : vector<1x16xf32>
    %c0_124 = arith.constant 0 : index
    %c0_125 = arith.constant 0 : index
    %464 = vector.load %arg16[%c0_124, %c0_125] : memref<1x16xf32, #tpu.memory_space<vmem>>, vector<1x16xf32>
    tpu.vector_store %arg16[%c0_124, %c0_125], %463 {strides = array<i32>} : memref<1x16xf32, #tpu.memory_space<vmem>>, vector<1x16xf32>,
    %cst_126 = arith.constant 0.000000e+00 : f32
    %465 = vector.broadcast %cst_126 : f32 to vector<1x16xf32>
    %466 = arith.subf %465, %463 : vector<1x16xf32>
    %cst_127 = arith.constant dense<0.000000e+00> : vector<1xf32>
    %467 = vector.multi_reduction <add>, %466, %cst_127 [1] : vector<1x16xf32> to vector<1xf32>
    %468 = vector.shape_cast %467 : vector<1xf32> to vector<1x1xf32>
    %cst_128 = arith.constant 6.250000e-02 : f32
    %469 = vector.broadcast %cst_128 : f32 to vector<1x1xf32>
    %470 = arith.mulf %468, %469 : vector<1x1xf32>
    %c0_129 = arith.constant 0 : index
    %c0_130 = arith.constant 0 : index
    %471 = vector.load %arg17[%c0_129, %c0_130] : memref<1x1xf32, #tpu.memory_space<vmem>>, vector<1x1xf32>
    tpu.vector_store %arg17[%c0_129, %c0_130], %470 {strides = array<i32>} : memref<1x1xf32, #tpu.memory_space<vmem>>, vector<1x1xf32>,
    return
  }
}

</mosaic_0001>

<bundles_post_ra>
// kernel: model_forward.1
= control target key start
LH: loop header
LB: loop body
LE: loop exit
PB: predicated region body
PF: predicated region fallthrough
CT: control target
= control target key end

     0   :  { %s4065_s0 = inlined_call_operand.vmem [shape: s32[16,1], index: 0, kind: input, shape index: {}]   ;;  %s4066_s1 = inlined_call_operand.vmem [shape: s32[1,16], index: 1, kind: input, shape index: {}]   ;;  %s4067_s2 = inlined_call_operand.vmem [shape: f32[32,32], index: 2, kind: input, shape index: {}]   ;;  %s4068_s3 = inlined_call_operand.vmem [shape: bf16[32,128], index: 3, kind: input, shape index: {}]   ;;  %s4069_s4 = inlined_call_operand.vmem [shape: bf16[32,128], index: 4, kind: input, shape index: {}]   ;;  %s4070_s5 = inlined_call_operand.hbm [shape: f32[1,128], index: 5, kind: input, shape index: {}]   ;;  %s4071_s6 = inlined_call_operand.vmem [shape: bf16[32,128], index: 6, kind: input, shape index: {}]   ;;  %s4072_s7 = inlined_call_operand.hbm [shape: bf16[32,128], index: 7, kind: input, shape index: {}]   ;;  %s4073_s8 = inlined_call_operand.hbm [shape: f32[1,128], index: 8, kind: input, shape index: {}]   ;;  %s4074_s9 = inlined_call_operand.vmem [shape: f32[2,2,32], index: 9, kind: input, shape index: {}]   ;;  %s4075_s10 = inlined_call_operand.vmem [shape: f32[2,2,32], index: 10, kind: input, shape index: {}]   ;;  %s4076_s11 = inlined_call_operand.hbm [shape: f32[10,32], index: 11, kind: input, shape index: {}]   ;;  %s4077_s12 = inlined_call_operand.hbm [shape: f32[16,32], index: 12, kind: input, shape index: {}]   ;;  %s4078_s13 = inlined_call_operand.hbm [shape: f32[8,16], index: 13, kind: input, shape index: {}]   ;;  %s4079_s14 = inlined_call_operand.hbm [shape: f32[8,32], index: 14, kind: input, shape index: {}]   ;;  %s4080_s15 = inlined_call_operand.vmem [shape: f32[16,8], index: 15, kind: input, shape index: {}]   ;;  %s4081_s16 = inlined_call_operand.hbm [shape: f32[1,16], index: 16, kind: output, shape index: {0}]   ;;  %s4082_s17 = inlined_call_operand.hbm [shape: f32[1,1], index: 17, kind: output, shape index: {1}]   ;;  %s4083_s18 = inlined_call_operand.hbm [shape: f32[2,2,32], index: 18, kind: output, shape index: {2}]   ;;  %s4084_s19 = inlined_call_operand.hbm [shape: f32[2,2,32], index: 19, kind: output, shape index: {3}]  }
   0x1   :  { %4090 = sst [smem:[#allocation28_spill]] %s4065_s0 }
   0x2   :  { %4091 = sst [smem:[#allocation29_spill]] %s4066_s1 }
   0x3   :  { %4092 = sst [smem:[#allocation30_spill]] %s4067_s2 }
   0x4   :  { %4093 = sst [smem:[#allocation31_spill]] %s4068_s3 }
   0x5   :  { %25 = vsyncpa [#allocation4], 0 }
   0x6   :  { %26 = vsyncpa [#allocation7], 0 }
   0x7   :  { %27 = vsyncpa [#allocation10], 0 }
   0x8   :  { %28 = vsyncpa [#allocation13], 0 }
   0x9   :  { %29 = vsyncpa [#allocation5], 0 }
   0xa   :  { %30 = vsyncpa [#allocation17], 0 }
   0xb   :  { %31 = vsyncpa [#allocation20], 0  ;;  %s3263_s0 = smov [#allocation6]   ;;  %s3007_s1 = scalar_lea.hbm %s4072_s7, 256 }
   0xc   :  { %s59_s30 = sshll.u32 %s3263_s0, 4  ;;  %p3008_p0 = scmp.ne.s32.totalorder %s4072_s7, %s3007_s1  ;;  %s60_s30 = int_to_ptr.vmem [resolvable:$true] %s59_s30 }
   0xd   :  { %p3011_p1 = scmp.lt.u32.totalorder %s3007_s1, %s4072_s7 }
   0xf   :  { %p3013_p2 = pnand %p3011_p1, %p3008_p0 }
  0x11   :  { %3016 = shalt.err (!%p3013_p2)
}
  0x12   :  { %s3017_s25 = scalar_lea.vmem %s60_s30, 256  ;;  %p3022_p4 = scmp.lt.s32.totalorder %s60_s30, %s60_s30 }
  0x13   :  { %p3018_p3 = scmp.ne.s32.totalorder %s60_s30, %s3017_s25  ;;  %p3023_p5 = scmp.lt.s32.totalorder %s3017_s25, %s3017_s25 }
  0x15   :  { %p3024_p6 = por %p3023_p5, %p3022_p4 }
  0x17   :  { %p3025_p7 = pnand %p3024_p6, %p3018_p3 }
  0x19   :  { %3028 = shalt.err (!%p3025_p7)
}
  0x1a   :  { %s4088_s3 = smov 64   ;;  %s3265_s26 = smov 4  }
  0x1b   :  { %65 = dma.hbm_to_vmem [thread:$0]  %s4072_s7, 256, %s60_s30, [#allocation7], %s4088_s3, %s4088_s3, %s3265_s26  }
  0x1c   :  { %s3266_s29 = smov [#allocation9]   ;;  %s3029_s1 = scalar_lea.hbm %s4076_s11, 256 }
  0x1d   :  { %s85_s0 = sshll.u32 %s3266_s29, 4  ;;  %p3030_p8 = scmp.ne.s32.totalorder %s4076_s11, %s3029_s1  ;;  %s86_s0 = int_to_ptr.vmem [resolvable:$true] %s85_s0 }
  0x1e   :  { %p3033_p9 = scmp.lt.u32.totalorder %s3029_s1, %s4076_s11 }
  0x20   :  { %p3035_p10 = pnand %p3033_p9, %p3030_p8 }
  0x22   :  { %3038 = shalt.err (!%p3035_p10)
}
  0x23   :  { %s3039_s25 = scalar_lea.vmem %s86_s0, 256  ;;  %p3044_p12 = scmp.lt.s32.totalorder %s86_s0, %s86_s0 }
  0x24   :  { %p3040_p11 = scmp.ne.s32.totalorder %s86_s0, %s3039_s25  ;;  %p3045_p13 = scmp.lt.s32.totalorder %s3039_s25, %s3039_s25 }
  0x26   :  { %p3046_p0 = por %p3045_p13, %p3044_p12 }
  0x28   :  { %p3047_p1 = pnand %p3046_p0, %p3040_p11 }
  0x2a   :  { %3050 = shalt.err (!%p3047_p1)
}
  0x2b   :  { %s3267_s7 = smov 128   ;;  %s3268_s30 = smov 8  }
  0x2c   :  { %91 = dma.hbm_to_vmem [thread:$0]  %s4076_s11, 256, %s86_s0, [#allocation10], %s3267_s7, %s3267_s7, %s3268_s30  }
  0x2d   :  { %s3269_s28 = smov [#allocation12]   ;;  %s3270_s20 = smov [#allocation3]  }
  0x2e   :  { %s110_s29 = sshll.u32 %s3269_s28, 4  ;;  %s48_s21 = sshll.u32 %s3270_s20, 4  ;;  %s111_s29 = int_to_ptr.vmem [resolvable:$true] %s110_s29  ;;  %s49_s21 = int_to_ptr.vmem [resolvable:$true] %s48_s21 }
  0x2f   :  { %s3051_s2 = scalar_lea.hbm %s4078_s13, 128 }
  0x30   :  { %p3052_p2 = scmp.ne.s32.totalorder %s4078_s13, %s3051_s2  ;;  %p3055_p3 = scmp.lt.u32.totalorder %s3051_s2, %s4078_s13 }
  0x32   :  { %p3057_p4 = pnand %p3055_p3, %p3052_p2 }
  0x34   :  { %3060 = shalt.err (!%p3057_p4)
}
  0x35   :  { %s3061_s11 = scalar_lea.vmem %s111_s29, 128  ;;  %p3066_p6 = scmp.lt.s32.totalorder %s111_s29, %s111_s29 }
  0x36   :  { %p3062_p5 = scmp.ne.s32.totalorder %s111_s29, %s3061_s11  ;;  %p3067_p7 = scmp.lt.s32.totalorder %s3061_s11, %s3061_s11 }
  0x38   :  { %p3068_p8 = por %p3067_p7, %p3066_p6 }
  0x3a   :  { %p3069_p9 = pnand %p3068_p8, %p3062_p5 }
  0x3c   :  { %3072 = shalt.err (!%p3069_p9)
}
  0x3d   :  { %113 = dma.hbm_to_vmem [thread:$0]  %s4078_s13, 128, %s111_s29, [#allocation13]  }
  0x3e   :  { %s3073_s20 = scalar_lea.hbm %s4070_s5, 16 }
  0x3f   :  { %p3074_p10 = scmp.ne.s32.totalorder %s4070_s5, %s3073_s20  ;;  %p3077_p11 = scmp.lt.u32.totalorder %s3073_s20, %s4070_s5 }
  0x41   :  { %p3079_p12 = pnand %p3077_p11, %p3074_p10 }
  0x43   :  { %3082 = shalt.err (!%p3079_p12)
}
  0x44   :  { %s3083_s23 = scalar_lea.vmem %s49_s21, 16  ;;  %s3087_s24 = scalar_lea.vmem %s49_s21, 32 }
  0x45   :  { %p3084_p13 = scmp.ne.s32.totalorder %s49_s21, %s3083_s23  ;;  %p3088_p0 = scmp.lt.s32.totalorder %s49_s21, %s49_s21 }
  0x46   :  { %p3089_p1 = scmp.lt.s32.totalorder %s3087_s24, %s3083_s23 }
  0x48   :  { %p3090_p2 = por %p3089_p1, %p3088_p0 }
  0x4a   :  { %p3091_p3 = pnand %p3090_p2, %p3084_p13 }
  0x4c   :  { %3094 = shalt.err (!%p3091_p3)
}
  0x4d   :  { %51 = dma.hbm_to_vmem [thread:$0]  %s4070_s5, 16, %s49_s21, [#allocation4]  }
  0x4e   :  { %s3271_s25 = smov [#allocation8]   ;;  %s3272_s0 = smov [#allocation11]  }
  0x4f   :  { %s72_s11 = sshll.u32 %s3271_s25, 4  ;;  %s97_s26 = sshll.u32 %s3272_s0, 4  ;;  %s73_s11 = int_to_ptr.vmem [resolvable:$true] %s72_s11  ;;  %s3438_s26 = int_to_ptr.vmem [resolvable:$true] %s97_s26 }
  0x50   :  { %s3095_s20 = scalar_lea.hbm %s4073_s8, 16 }
  0x51   :  { %p3096_p4 = scmp.ne.s32.totalorder %s4073_s8, %s3095_s20  ;;  %p3099_p5 = scmp.lt.u32.totalorder %s3095_s20, %s4073_s8 }
  0x53   :  { %p3101_p6 = pnand %p3099_p5, %p3096_p4 }
  0x55   :  { %3104 = shalt.err (!%p3101_p6)
}
  0x56   :  { %s3105_s5 = scalar_lea.vmem %s73_s11, 16  ;;  %s3109_s21 = scalar_lea.vmem %s73_s11, 32 }
  0x57   :  { %p3106_p7 = scmp.ne.s32.totalorder %s73_s11, %s3105_s5  ;;  %p3110_p8 = scmp.lt.s32.totalorder %s73_s11, %s73_s11 }
  0x58   :  { %p3111_p9 = scmp.lt.s32.totalorder %s3109_s21, %s3105_s5 }
  0x5a   :  { %p3112_p10 = por %p3111_p9, %p3110_p8 }
  0x5c   :  { %p3113_p11 = pnand %p3112_p10, %p3106_p7 }
  0x5e   :  { %3116 = shalt.err (!%p3113_p11)
}
  0x5f   :  { %75 = dma.hbm_to_vmem [thread:$0]  %s4073_s8, 16, %s73_s11, [#allocation7]  }
  0x60   :  { %s3117_s25 = scalar_lea.hbm %s4077_s12, 256 }
  0x61   :  { %p3118_p12 = scmp.ne.s32.totalorder %s4077_s12, %s3117_s25  ;;  %p3121_p13 = scmp.lt.u32.totalorder %s3117_s25, %s4077_s12 }
  0x63   :  { %p3123_p0 = pnand %p3121_p13, %p3118_p12 }
  0x65   :  { %3126 = shalt.err (!%p3123_p0)
}
  0x66   :  { %s3127_s1 = scalar_lea.vmem %s3438_s26, 256  ;;  %p3132_p2 = scmp.lt.s32.totalorder %s3438_s26, %s3438_s26 }
  0x67   :  { %p3128_p1 = scmp.ne.s32.totalorder %s3438_s26, %s3127_s1  ;;  %p3133_p3 = scmp.lt.s32.totalorder %s3127_s1, %s3127_s1 }
  0x69   :  { %p3134_p4 = por %p3133_p3, %p3132_p2 }
  0x6b   :  { %p3135_p5 = pnand %p3134_p4, %p3128_p1 }
  0x6d   :  { %3138 = shalt.err (!%p3135_p5)
}
  0x6e   :  { %103 = dma.hbm_to_vmem [thread:$0]  %s4077_s12, 256, %s3438_s26, [#allocation10], %s3267_s7, %s3267_s7, %s3268_s30  }
  0x6f   :  { %s3273_s3 = smov [#allocation14]   ;;  %s3139_s21 = scalar_lea.hbm %s4079_s14, 128 }
  0x70   :  { %s120_s22 = sshll.u32 %s3273_s3, 4  ;;  %p3140_p6 = scmp.ne.s32.totalorder %s4079_s14, %s3139_s21  ;;  %s121_s22 = int_to_ptr.vmem [resolvable:$true] %s120_s22 }
  0x71   :  { %p3143_p7 = scmp.lt.u32.totalorder %s3139_s21, %s4079_s14 }
  0x73   :  { %p3145_p8 = pnand %p3143_p7, %p3140_p6 }
  0x75   :  { %3148 = shalt.err (!%p3145_p8)
}
  0x76   :  { %s3149_s25 = scalar_lea.vmem %s121_s22, 128  ;;  %p3154_p10 = scmp.lt.s32.totalorder %s121_s22, %s121_s22 }
  0x77   :  { %p3150_p9 = scmp.ne.s32.totalorder %s121_s22, %s3149_s25  ;;  %p3155_p11 = scmp.lt.s32.totalorder %s3149_s25, %s3149_s25 }
  0x79   :  { %p3156_p12 = por %p3155_p11, %p3154_p10 }
  0x7b   :  { %p3157_p13 = pnand %p3156_p12, %p3150_p9 }
  0x7d   :  { %3160 = shalt.err (!%p3157_p13)
}
  0x7e   :  { %123 = dma.hbm_to_vmem [thread:$0]  %s4079_s14, 128, %s121_s22, [#allocation13]  }
  0x7f   :  { %3249 = dma.done.wait [#allocation4], 16  }
  0x80   :  { %3250 = vsyncadd [#allocation4], 4294967280 }
  0x81   :  { %3251 = dma.done.wait [#allocation7], 272  }
  0x82   :  { %3252 = vsyncadd [#allocation7], 4294967024 }
  0x83   :  { %3253 = dma.done.wait [#allocation10], 512  }
  0x84   :  { %3254 = vsyncadd [#allocation10], 4294966784 }
  0x85   :  { %3255 = dma.done.wait [#allocation13], 256  }
  0x86   :  { %3256 = vsyncadd [#allocation13], 4294967040  ;;  %v3274_v0 = vmov 0   ;;  %s4094_s0 = sld [smem:[#allocation28_spill]]  ;;  %s4095_s20 = sld [smem:[#allocation30_spill]]  ;;  %v3275_v9 = vmov 0.0   ;;  %v150_v11 = vlaneseq }
  0x87   :  { %2847 = vset.pattern.permute.xlu0 %v3274_v0  ;;  %2587 = vmatprep.subr.bf16.mxu1 %v3275_v9  ;;  %s4096_s24 = sld [smem:[#allocation31_spill]]  ;;  %vm168_vm0 = vcmask 261120   ;;  %v3514_v16 = vld [vmem:[%s4069_s4] sm:$0xff]   ;;  %v3523_v18 = vld [vmem:[%s4069_s4 + $0x8] sm:$0xff]   ;;  %vm3276_vm3 = vmmov 0   ;;  %s4097_s27 = smov 64  }
  0x88   :  { %v151_v12 = vand.u32 127, %v150_v11  ;;  %v331_v20 = vld [vmem:[%s4074_s9] sm:$0x3]  ;;  %2591 = vmatprep.mubr.msk.bf16.mxu1 %vm3276_vm3, %v3275_v9  ;;  %v2425_v29 = vld [vmem:[#allocation3] ss:$0 sm:$0xff]  ;;  %s3277_s14 = smov 32  }
  0x89   :  { %v337_v21 = vpack.c.bf16 %v331_v20, %v331_v20  ;;  %v334_v38 = vld [vmem:[%s4075_s10] sm:$0x3]  ;;  %v3558_v49 = vld [vmem:[#allocation6] sm:$0xff]   ;;  %v2429_v52 = vld [vmem:[%s4074_s9 + $0x2] sm:$0x3]  ;;  %vm576_vm4 = vcmask 254976  }
  0x8a   :  { %v3563_v50 = vld [vmem:[%s4071_s6] sm:$0xff]   ;;  %v3576_v53 = vld [vmem:[%s4071_s6 + $0x8] sm:$0xff]   ;;  %v423_v54 = vpack.c.bf16 %v2429_v52, %v2429_v52  ;;  %vm1950_vm5 = vcmask 261126   ;;  %vm2018_vm6 = vcmask 130048   ;;  %vm2020_vm7 = vcmask 123904   ;;  %s3280_s28 = smov [#allocation15]  }
  0x8b   :  { %v3566_v51 = vld [vmem:[#allocation6 + $0x8] sm:$0xff]   ;;  %v3606_v0 = vld [vmem:[#allocation8] ss:$0 sm:$0xff]  ;;  %vm2214_vm8 = vcmask 1043456   ;;  %vm2210_vm9 = vcmask 64512  }
  0x8c   :  { %v148_v1 = vld [vmem:[%s4094_s0] sm:$0xff]  ;;  %v165_v3 = vld [vmem:[%s4095_s20 + $0x8] sm:$0xff]  ;;  %v166_v4 = vld [vmem:[%s4095_s20 + $0x10] sm:$0xff] }
  0x8d   :  { %v164_v2 = vld [vmem:[%s4095_s20] sm:$0xff]  ;;  %153 = vperm.xlu0 %2847, %v148_v1   ;;  %v167_v5 = vld [vmem:[%s4095_s20 + $0x18] sm:$0xff]  ;;  %v149_v6 = vld [vmem:[%s4094_s0 + $0x8] sm:$0xff]  ;;  %s2364_s20 = sshll.u32 %s3280_s28, 4  ;;  %s2365_s20 = int_to_ptr.vmem [resolvable:$true] %s2364_s20 }
  0x8e   :  { %v2817_v7 = vpack.c.bf16 %v165_v3, %v164_v2  ;;  %v2821_v8 = vpack.c.bf16 %v167_v5, %v166_v4  ;;  %v2849_v10 = vld [vmem:[%s4096_s24] sm:$0xff]   ;;  %v2851_v19 = vld [vmem:[%s4096_s24 + $0x8] sm:$0xff]   ;;  %s3161_s1 = scalar_lea.vmem %s2365_s20, 16  ;;  %s3165_s8 = scalar_lea.vmem %s2365_s20, 32 }
  0x8f   :  { %2588 = vmatpush3.bf16.msra.mxu1 %v2849_v10  ;;  %p3162_p0 = scmp.ne.s32.totalorder %s2365_s20, %s3161_s1  ;;  %p3166_p1 = scmp.lt.s32.totalorder %s2365_s20, %s2365_s20 }
  0x90   :  { %2818 = vmatprep.subr.bf16.mxu0 %v2817_v7  ;;  %2589 = vmatprep.subr.bf16.mxu1 %v3275_v9  ;;  %p3167_p2 = scmp.lt.s32.totalorder %s3165_s8, %s3161_s1 }
  0x91   :  { %156 = vperm.xlu0 %2847, %v149_v6   ;;  %2820 = vmatpush3.bf16.msra.mxu0 %v2817_v7 }
  0x92   :  { %2822 = vmatprep.subr.bf16.mxu0 %v2821_v8  ;;  %p3168_p3 = por %p3167_p2, %p3166_p1 }
  0x93   :  { %2590 = vmatpush3.bf16.msra.mxu1 %v2851_v19  ;;  %v2430_v19 = vld [vmem:[%s4075_s10 + $0x2] sm:$0x3] }
  0x94   :  { %2603 = vmatprep.subr.bf16.mxu1 %v3275_v9  ;;  %p3169_p4 = pnand %p3168_p3, %p3162_p0 }
  0x95   :  { %2824 = vmatpush3.bf16.msra.mxu0 %v2821_v8 }
  0x96   :  { %2595 = vmatprep.subr.bf16.mxu0 %v3275_v9 }
 0x10c   :  { %v154_v13 = vpop.permute.xlu0 %153 }
 0x10d   :  { %vm158_vm1 = vcmp.eq.s32.totalorder %v151_v12, %v154_v13 }
 0x10e   :  { %v2421_v14 = vsel %vm158_vm1, 1.0, %v3275_v9 }
 0x10f   :  { %2584 = vmatprep.mubr.msk.f32.mxu0 %vm168_vm0, %v2421_v14 }
 0x110   :  { %v157_v15 = vpop.permute.xlu0 %156 }
 0x111   :  { %vm159_vm2 = vcmp.eq.s32.totalorder %v151_v12, %v157_v15 }
 0x112   :  { %v2422_v17 = vsel %vm159_vm2, 1.0, %v3275_v9 }
 0x113   :  { %2585 = vmatmul.mubr.msk.f32.vlgmr.msra.gmra.mrb[0].mxu0 %vm168_vm0, %v2422_v17 }
 0x114   :  { %2596 = vmatpush3.bf16.msra.mxu0 %v3514_v16  ;;  %2599 = vmatprep.mubr.msk.bf16.mxu0 %vm3276_vm3, %v3275_v9 }
 0x115   :  { %2597 = vmatprep.subr.bf16.mxu0 %v3275_v9 }
 0x118   :  { %2598 = vmatpush3.bf16.msra.mxu0 %v3523_v18 }
 0x119   :  { %2611 = vmatprep.subr.bf16.mxu0 %v3275_v9 }
 0x11b   :  { %2600 = vmatmul.mubr.msk.bf16.vlgmr.msra.gmra.mrb[4].mxu0 %vm168_vm0, %v337_v21 }
 0x11c   :  { %2615 = vmatprep.mubr.msk.bf16.mxu0 %vm3276_vm3, %v3275_v9  ;;  %2612 = vmatpush3.bf16.msra.mxu0 %v3563_v50 }
 0x11d   :  { %2613 = vmatprep.subr.bf16.mxu0 %v3275_v9 }
 0x120   :  { %2614 = vmatpush3.bf16.msra.mxu0 %v3576_v53 }
 0x121   :  { %2627 = vmatprep.subr.bf16.mxu0 %v3275_v9 }
 0x1e6   :  { %v2586_v22 = vpop.f32.mrb[0].mxu0 }
 0x1e7   :  { %v241_v23 = vpop.f32.mrb[1].mxu0 }
 0x1e8   :  { %v250_v24 = vpack.c.bf16 %v2586_v22, %v241_v23 }
 0x1ea   :  { %2592 = vmatmul.mubr.msk.bf16.vlgmr.msra.gmra.mrb[0].mxu1 %vm168_vm0, %v250_v24 }
 0x1eb   :  { %2607 = vmatprep.mubr.msk.bf16.mxu1 %vm3276_vm3, %v3275_v9  ;;  %2604 = vmatpush3.bf16.msra.mxu1 %v3558_v49 }
 0x1ec   :  { %2605 = vmatprep.subr.bf16.mxu1 %v3275_v9 }
 0x1ee   :  { %v387_v25 = vpop.f32.mrb[4].mxu0 }
 0x1ef   :  { %v2601_v26 = vpop.f32.mrb[5].mxu0  ;;  %2606 = vmatpush3.bf16.msra.mxu1 %v3566_v51 }
 0x1f0   :  { %v390_v27 = vpop.f32.mrb[6].mxu0  ;;  %2619 = vmatprep.subr.bf16.mxu1 %v3275_v9 }
 0x1f1   :  { %v2602_v28 = vpop.f32.mrb[7].mxu0 }
 0x1f2   :  { %2608 = vmatmul.mubr.msk.bf16.vlgmr.msra.gmra.mrb[4].mxu1 %vm168_vm0, %v423_v54 }
 0x1f3   :  { %2620 = vmatpush3.bf16.msra.mxu1 %v3514_v16  ;;  %2623 = vmatprep.mubr.msk.bf16.mxu1 %vm3276_vm3, %v3275_v9 }
 0x1f4   :  { %2621 = vmatprep.subr.bf16.mxu1 %v3275_v9 }
 0x1f7   :  { %2622 = vmatpush3.bf16.msra.mxu1 %v3523_v18 }
 0x1f8   :  { %2635 = vmatprep.subr.bf16.mxu1 %v3275_v9 }
 0x2bd   :  { %v311_v30 = vpop.f32.mrb[0].mxu1 }
 0x2be   :  { %v3544_v31 = vadd.f32 %v2425_v29, %v311_v30  ;;  %v2593_v32 = vpop.f32.mrb[1].mxu1 }
 0x2bf   :  { %v314_v33 = vpop.f32.mrb[2].mxu1 }
 0x2c0   :  { %v3546_v34 = vadd.f32 %v2425_v29, %v314_v33  ;;  %v2594_v35 = vpop.f32.mrb[3].mxu1  ;;  %v393_v36 = vadd.f32 %v387_v25, %v3544_v31 }
 0x2c2   :  { %2856 = vtanh.f32 %v393_v36  ;;  %v2434_v39 = vmul.f32 -1.442695, %v393_v36 }
 0x2c4   :  { %2858 = vpow2.f32 %v2434_v39 }
 0x2c5   :  { %v473_v59 = vpop.f32.mrb[4].mxu1 }
 0x2c6   :  { %v2609_v60 = vpop.f32.mrb[5].mxu1 }
 0x2c7   :  { %v476_v61 = vpop.f32.mrb[6].mxu1 }
 0x2c8   :  { %v2610_v62 = vpop.f32.mrb[7].mxu1 }
 0x2cc   :  { %v2857_v37 = vpop.eup %2856 }
 0x2cd   :  { %407 = vrot.lane.b32.xlu1 %v2857_v37, %s4097_s27 }
 0x2ce   :  { %v2859_v40 = vpop.eup %2858 }
 0x2cf   :  { %v397_v41 = vadd.f32 1.0, %v2859_v40 }
 0x2d1   :  { %402 = vrot.lane.b32.xlu1 %v334_v38, %s3277_s14  ;;  %2860 = vrcp.f32 %v397_v41 }
 0x2db   :  { %v2861_v42 = vpop.eup %2860 }
 0x33f   :  { %v408_v43 = vpop.permute.xlu1 %407 }
 0x340   :  { %v410_v44 = vmul.f32 %v2861_v42, %v408_v43 }
 0x342   :  { %412 = vrot.lane.b32.xlu0 %v410_v44, %s3277_s14 }
 0x343   :  { %v403_v45 = vpop.permute.xlu1 %402 }
 0x344   :  { %v405_v46 = vmul.f32 %v2861_v42, %v403_v45 }
 0x3b4   :  { %v413_v47 = vpop.permute.xlu0 %412 }
 0x3b5   :  { %v3555_v48 = vadd.f32 %v413_v47, %v405_v46 }
 0x3b7   :  { %2862 = vtanh.f32 %v3555_v48  ;;  %v630_v35 = vrot.slane %v3555_v48, 6 }
 0x3c1   :  { %v2863_v55 = vpop.eup %2862 }
 0x3c2   :  { %418 = vrot.lane.b32.xlu1 %v2863_v55, %s4097_s27 }
 0x434   :  { %v419_v56 = vpop.permute.xlu1 %418 }
 0x435   :  { %v421_v57 = vmul.f32 %v2861_v42, %v419_v56 }
 0x437   :  { %v422_v58 = vpack.c.bf16 %v421_v57, %v421_v57 }
 0x439   :  { %480 = vrot.lane.b32.xlu0 %v422_v58, %s3277_s14 }
 0x4ab   :  { %v481_v63 = vpop.permute.xlu0 %480 }
 0x4ac   :  { %2616 = vmatmul.mubr.msk.bf16.vlgmr.msra.gmra.mrb[8].mxu0 %vm168_vm0, %v481_v63  ;;  %2624 = vmatmul.mubr.msk.bf16.vlgmr.msra.gmra.mrb[8].mxu1 %vm168_vm0, %v481_v63 }
 0x4ad   :  { %2628 = vmatpush3.bf16.msra.mxu0 %v3558_v49  ;;  %2636 = vmatpush3.bf16.msra.mxu1 %v3563_v50 }
 0x4ae   :  { %2629 = vmatprep.subr.bf16.mxu0 %v3275_v9  ;;  %2637 = vmatprep.subr.bf16.mxu1 %v3275_v9 }
 0x4af   :  { %2631 = vmatprep.mubr.msk.bf16.mxu0 %vm3276_vm3, %v3275_v9  ;;  %2639 = vmatprep.mubr.msk.bf16.mxu1 %vm3276_vm3, %v3275_v9 }
 0x4b1   :  { %2630 = vmatpush3.bf16.msra.mxu0 %v3566_v51  ;;  %2638 = vmatpush3.bf16.msra.mxu1 %v3576_v53 }
 0x4b2   :  { %2643 = vmatprep.subr.bf16.mxu0 %v3275_v9  ;;  %2651 = vmatprep.subr.bf16.mxu1 %v3275_v9 }
 0x57f   :  { %v531_v1 = vpop.f32.mrb[8].mxu0  ;;  %v612_v2 = vpop.f32.mrb[8].mxu1 }
 0x580   :  { %v532_v3 = vadd.f32 %v531_v1, %v473_v59  ;;  %v619_v4 = vrot.slane %v612_v2, 6  ;;  %v2617_v5 = vpop.f32.mrb[9].mxu0  ;;  %v2625_v6 = vpop.f32.mrb[9].mxu1 }
 0x581   :  { %v534_v7 = vpop.f32.mrb[10].mxu0  ;;  %v615_v8 = vpop.f32.mrb[10].mxu1 }
 0x582   :  { %v543_v10 = vadd.f32 %v3606_v0, %v532_v3  ;;  %v621_v12 = vadd.f32 %v619_v4, %v3544_v31  ;;  %v2618_v13 = vpop.f32.mrb[11].mxu0  ;;  %v2626_v14 = vpop.f32.mrb[11].mxu1 }
 0x584   :  { %2864 = vtanh.f32 %v543_v10  ;;  %v2442_v20 = vmul.f32 -1.442695, %v543_v10  ;;  %v2444_v21 = vmul.f32 -1.442695, %v621_v12 }
 0x585   :  { %2866 = vtanh.f32 %v621_v12 }
 0x586   :  { %2868 = vpow2.f32 %v2442_v20 }
 0x587   :  { %2870 = vpow2.f32 %v2444_v21 }
 0x58e   :  { %v2865_v15 = vpop.eup %2864 }
 0x58f   :  { %v2867_v17 = vpop.eup %2866  ;;  %557 = vrot.lane.b32.xlu1 %v2865_v15, %s4097_s27 }
 0x590   :  { %634 = vrot.lane.b32.xlu0 %v2867_v17, %s4097_s27  ;;  %v2869_v22 = vpop.eup %2868 }
 0x591   :  { %v2871_v23 = vpop.eup %2870  ;;  %v547_v24 = vadd.f32 1.0, %v2869_v22 }
 0x592   :  { %v625_v25 = vadd.f32 1.0, %v2871_v23 }
 0x593   :  { %552 = vrot.lane.b32.xlu1 %v2430_v19, %s3277_s14  ;;  %2872 = vrcp.f32 %v547_v24 }
 0x594   :  { %2874 = vrcp.f32 %v625_v25 }
 0x59d   :  { %v2873_v26 = vpop.eup %2872 }
 0x59e   :  { %v2875_v28 = vpop.eup %2874 }
 0x59f   :  { %v632_v38 = vmul.f32 %v2875_v28, %v630_v35 }
 0x601   :  { %v558_v27 = vpop.permute.xlu1 %557 }
 0x602   :  { %v560_v29 = vmul.f32 %v2873_v26, %v558_v27  ;;  %v635_v30 = vpop.permute.xlu0 %634 }
 0x603   :  { %v637_v32 = vmul.f32 %v2875_v28, %v635_v30 }
 0x604   :  { %562 = vrot.lane.b32.xlu0 %v560_v29, %s3277_s14 }
 0x605   :  { %639 = vrot.lane.b32.xlu1 %v637_v32, %s3277_s14  ;;  %v553_v33 = vpop.permute.xlu1 %552 }
 0x606   :  { %v555_v36 = vmul.f32 %v2873_v26, %v553_v33 }
 0x676   :  { %v563_v37 = vpop.permute.xlu0 %562 }
 0x677   :  { %v3619_v39 = vadd.f32 %v563_v37, %v555_v36  ;;  %v640_v40 = vpop.permute.xlu1 %639 }
 0x678   :  { %v3621_v41 = vadd.f32 %v640_v40, %v632_v38 }
 0x679   :  { %2876 = vtanh.f32 %v3619_v39 }
 0x67a   :  { %2878 = vtanh.f32 %v3621_v41  ;;  %v826_v32 = vrot.slane %v3621_v41, 6 }
 0x683   :  { %v2877_v42 = vpop.eup %2876 }
 0x684   :  { %v2879_v43 = vpop.eup %2878  ;;  %568 = vrot.lane.b32.xlu0 %v2877_v42, %s4097_s27 }
 0x685   :  { %645 = vrot.lane.b32.xlu1 %v2879_v43, %s4097_s27 }
 0x6f6   :  { %v569_v44 = vpop.permute.xlu0 %568 }
 0x6f7   :  { %v3627_v45 = vmul.f32 %v2873_v26, %v569_v44  ;;  %v646_v46 = vpop.permute.xlu1 %645 }
 0x6f8   :  { %v648_v47 = vmul.f32 %v2875_v28, %v646_v46 }
 0x6f9   :  { %v650_v48 = vpack.c.bf16 %v3627_v45, %v3627_v45 }
 0x6fa   :  { %v649_v52 = vpack.c.bf16 %v648_v47, %v648_v47 }
 0x6fb   :  { %652 = vrot.lane.b32.xlu0 %v650_v48, %s3277_s14 }
 0x6fc   :  { %v698_v54 = vrot.slane %v649_v52, 1 }
 0x6fe   :  { %699 = vrot.lane.b32.xlu1 %v698_v54, %s3277_s14 }
 0x76d   :  { %v653_v55 = vpop.permute.xlu0 %652 }
 0x76e   :  { %2632 = vmatmul.mubr.msk.bf16.vlgmr.msra.gmra.mrb[12].mxu0 %vm168_vm0, %v653_v55 }
 0x76f   :  { %2644 = vmatpush3.bf16.msra.mxu0 %v3514_v16  ;;  %2647 = vmatprep.mubr.msk.bf16.mxu0 %vm3276_vm3, %v3275_v9 }
 0x770   :  { %v700_v56 = vpop.permute.xlu1 %699  ;;  %2645 = vmatprep.subr.bf16.mxu0 %v3275_v9 }
 0x771   :  { %2640 = vmatmul.mubr.msk.bf16.vlgmr.msra.gmra.mrb[12].mxu1 %vm168_vm0, %v700_v56 }
 0x772   :  { %2652 = vmatpush3.bf16.msra.mxu1 %v3558_v49  ;;  %2655 = vmatprep.mubr.msk.bf16.mxu1 %vm3276_vm3, %v3275_v9 }
 0x773   :  { %2646 = vmatpush3.bf16.msra.mxu0 %v3523_v18  ;;  %2653 = vmatprep.subr.bf16.mxu1 %v3275_v9 }
 0x774   :  { %2659 = vmatprep.subr.bf16.mxu0 %v3275_v9 }
 0x776   :  { %2648 = vmatmul.mubr.msk.bf16.vlgmr.msra.gmra.mrb[16].mxu0 %vm168_vm0, %v700_v56  ;;  %2654 = vmatpush3.bf16.msra.mxu1 %v3566_v51 }
 0x777   :  { %2667 = vmatprep.subr.bf16.mxu1 %v3275_v9  ;;  %2660 = vmatpush3.bf16.msra.mxu0 %v3563_v50 }
 0x778   :  { %2661 = vmatprep.subr.bf16.mxu0 %v3275_v9  ;;  %2663 = vmatprep.mubr.msk.bf16.mxu0 %vm3276_vm3, %v3275_v9 }
 0x77b   :  { %2662 = vmatpush3.bf16.msra.mxu0 %v3576_v53 }
 0x77c   :  { %2675 = vmatprep.subr.bf16.mxu0 %v3275_v9 }
 0x841   :  { %v691_v57 = vpop.f32.mrb[12].mxu0 }
 0x842   :  { %v2633_v58 = vpop.f32.mrb[13].mxu0 }
 0x843   :  { %v694_v59 = vpop.f32.mrb[14].mxu0 }
 0x844   :  { %v738_v60 = vpop.f32.mrb[12].mxu1  ;;  %v2634_v61 = vpop.f32.mrb[15].mxu0 }
 0x845   :  { %v739_v62 = vadd.f32 %v738_v60, %v691_v57  ;;  %v2641_v63 = vpop.f32.mrb[13].mxu1 }
 0x846   :  { %v741_v1 = vpop.f32.mrb[14].mxu1 }
 0x847   :  { %v744_v2 = vadd.f32 %v3606_v0, %v739_v62  ;;  %v2642_v3 = vpop.f32.mrb[15].mxu1 }
 0x849   :  { %2880 = vtanh.f32 %v744_v2  ;;  %v808_v4 = vpop.f32.mrb[16].mxu0  ;;  %v2447_v14 = vmul.f32 -1.442695, %v744_v2 }
 0x84a   :  { %v815_v5 = vrot.slane %v808_v4, 4  ;;  %v2649_v6 = vpop.f32.mrb[17].mxu0 }
 0x84b   :  { %v811_v7 = vpop.f32.mrb[18].mxu0 }
 0x84c   :  { %v817_v8 = vadd.f32 %v815_v5, %v3544_v31  ;;  %v2650_v10 = vpop.f32.mrb[19].mxu0 }
 0x84e   :  { %2882 = vtanh.f32 %v817_v8  ;;  %v2449_v15 = vmul.f32 -1.442695, %v817_v8 }
 0x84f   :  { %2884 = vpow2.f32 %v2447_v14 }
 0x850   :  { %2886 = vpow2.f32 %v2449_v15 }
 0x853   :  { %v2881_v12 = vpop.eup %2880 }
 0x854   :  { %754 = vrot.lane.b32.xlu0 %v2881_v12, %s4097_s27 }
 0x858   :  { %v2883_v13 = vpop.eup %2882 }
 0x859   :  { %830 = vrot.lane.b32.xlu1 %v2883_v13, %s4097_s27  ;;  %v2885_v17 = vpop.eup %2884 }
 0x85a   :  { %v748_v19 = vadd.f32 1.0, %v2885_v17  ;;  %v2887_v20 = vpop.eup %2886 }
 0x85b   :  { %v821_v21 = vadd.f32 1.0, %v2887_v20 }
 0x85c   :  { %2888 = vrcp.f32 %v748_v19 }
 0x85d   :  { %2890 = vrcp.f32 %v821_v21 }
 0x866   :  { %v2889_v22 = vpop.eup %2888 }
 0x867   :  { %v2891_v25 = vpop.eup %2890  ;;  %v752_v28 = vmul.f32 %v2889_v22, %v3619_v39 }
 0x868   :  { %v828_v33 = vmul.f32 %v2891_v25, %v826_v32 }
 0x8c6   :  { %v755_v23 = vpop.permute.xlu0 %754 }
 0x8c7   :  { %v757_v24 = vmul.f32 %v2889_v22, %v755_v23 }
 0x8c9   :  { %759 = vrot.lane.b32.xlu0 %v757_v24, %s3277_s14 }
 0x8cb   :  { %v831_v26 = vpop.permute.xlu1 %830 }
 0x8cc   :  { %v833_v27 = vmul.f32 %v2891_v25, %v831_v26 }
 0x8ce   :  { %835 = vrot.lane.b32.xlu1 %v833_v27, %s3277_s14 }
 0x93b   :  { %v760_v29 = vpop.permute.xlu0 %759 }
 0x93c   :  { %v3661_v30 = vadd.f32 %v760_v29, %v752_v28 }
 0x93e   :  { %2892 = vtanh.f32 %v3661_v30 }
 0x940   :  { %v836_v35 = vpop.permute.xlu1 %835 }
 0x941   :  { %v3665_v36 = vadd.f32 %v836_v35, %v828_v33 }
 0x943   :  { %2894 = vtanh.f32 %v3665_v36  ;;  %v1022_v23 = vrot.slane %v3665_v36, 6 }
 0x948   :  { %v2893_v37 = vpop.eup %2892 }
 0x949   :  { %765 = vrot.lane.b32.xlu0 %v2893_v37, %s4097_s27 }
 0x94d   :  { %v2895_v38 = vpop.eup %2894 }
 0x94e   :  { %841 = vrot.lane.b32.xlu1 %v2895_v38, %s4097_s27 }
 0x9bb   :  { %v766_v39 = vpop.permute.xlu0 %765 }
 0x9bc   :  { %v3670_v40 = vmul.f32 %v2889_v22, %v766_v39 }
 0x9be   :  { %v846_v41 = vpack.c.bf16 %v3670_v40, %v3670_v40 }
 0x9c0   :  { %848 = vrot.lane.b32.xlu0 %v846_v41, %s3277_s14  ;;  %v842_v42 = vpop.permute.xlu1 %841 }
 0x9c1   :  { %v844_v43 = vmul.f32 %v2891_v25, %v842_v42 }
 0x9c3   :  { %v845_v44 = vpack.c.bf16 %v844_v43, %v844_v43 }
 0x9c5   :  { %v894_v46 = vrot.slane %v845_v44, 2 }
 0x9c7   :  { %895 = vrot.lane.b32.xlu1 %v894_v46, %s3277_s14 }
 0xa32   :  { %v849_v47 = vpop.permute.xlu0 %848 }
 0xa33   :  { %2656 = vmatmul.mubr.msk.bf16.vlgmr.msra.gmra.mrb[16].mxu1 %vm168_vm0, %v849_v47 }
 0xa34   :  { %2668 = vmatpush3.bf16.msra.mxu1 %v3514_v16  ;;  %2671 = vmatprep.mubr.msk.bf16.mxu1 %vm3276_vm3, %v3275_v9 }
 0xa35   :  { %2669 = vmatprep.subr.bf16.mxu1 %v3275_v9 }
 0xa38   :  { %2670 = vmatpush3.bf16.msra.mxu1 %v3523_v18 }
 0xa39   :  { %v896_v48 = vpop.permute.xlu1 %895  ;;  %2683 = vmatprep.subr.bf16.mxu1 %v3275_v9 }
 0xa3a   :  { %2664 = vmatmul.mubr.msk.bf16.vlgmr.msra.gmra.mrb[20].mxu0 %vm168_vm0, %v896_v48 }
 0xa3b   :  { %2672 = vmatmul.mubr.msk.bf16.vlgmr.msra.gmra.mrb[20].mxu1 %vm168_vm0, %v896_v48  ;;  %2676 = vmatpush3.bf16.msra.mxu0 %v3558_v49 }
 0xa3c   :  { %2684 = vmatpush3.bf16.msra.mxu1 %v3563_v50  ;;  %2677 = vmatprep.subr.bf16.mxu0 %v3275_v9 }
 0xa3d   :  { %2685 = vmatprep.subr.bf16.mxu1 %v3275_v9  ;;  %2679 = vmatprep.mubr.msk.bf16.mxu0 %vm3276_vm3, %v3275_v9 }
 0xa3e   :  { %2687 = vmatprep.mubr.msk.bf16.mxu1 %vm3276_vm3, %v3275_v9 }
 0xa3f   :  { %2678 = vmatpush3.bf16.msra.mxu0 %v3566_v51 }
 0xa40   :  { %2686 = vmatpush3.bf16.msra.mxu1 %v3576_v53  ;;  %2691 = vmatprep.subr.bf16.mxu0 %v3275_v9 }
 0xa41   :  { %2699 = vmatprep.subr.bf16.mxu1 %v3275_v9 }
 0xb06   :  { %v887_v52 = vpop.f32.mrb[16].mxu1 }
 0xb07   :  { %v2657_v54 = vpop.f32.mrb[17].mxu1 }
 0xb08   :  { %v890_v55 = vpop.f32.mrb[18].mxu1 }
 0xb09   :  { %v2658_v56 = vpop.f32.mrb[19].mxu1 }
 0xb0d   :  { %v934_v57 = vpop.f32.mrb[20].mxu0 }
 0xb0e   :  { %v935_v58 = vadd.f32 %v934_v57, %v887_v52  ;;  %v1004_v59 = vpop.f32.mrb[20].mxu1  ;;  %v2665_v60 = vpop.f32.mrb[21].mxu0 }
 0xb0f   :  { %v1011_v61 = vrot.slane %v1004_v59, 2  ;;  %v2673_v62 = vpop.f32.mrb[21].mxu1  ;;  %v937_v63 = vpop.f32.mrb[22].mxu0 }
 0xb10   :  { %v940_v1 = vadd.f32 %v3606_v0, %v935_v58  ;;  %v1007_v2 = vpop.f32.mrb[22].mxu1  ;;  %v2666_v3 = vpop.f32.mrb[23].mxu0 }
 0xb11   :  { %v1013_v4 = vadd.f32 %v1011_v61, %v3544_v31  ;;  %v2674_v5 = vpop.f32.mrb[23].mxu1 }
 0xb12   :  { %2896 = vtanh.f32 %v940_v1  ;;  %v2452_v8 = vmul.f32 -1.442695, %v940_v1 }
 0xb13   :  { %2898 = vtanh.f32 %v1013_v4  ;;  %v2454_v10 = vmul.f32 -1.442695, %v1013_v4 }
 0xb14   :  { %2900 = vpow2.f32 %v2452_v8 }
 0xb15   :  { %2902 = vpow2.f32 %v2454_v10 }
 0xb1c   :  { %v2897_v6 = vpop.eup %2896 }
 0xb1d   :  { %v2899_v7 = vpop.eup %2898  ;;  %950 = vrot.lane.b32.xlu1 %v2897_v6, %s4097_s27 }
 0xb1e   :  { %1026 = vrot.lane.b32.xlu0 %v2899_v7, %s4097_s27  ;;  %v2901_v12 = vpop.eup %2900 }
 0xb1f   :  { %v2903_v13 = vpop.eup %2902  ;;  %v944_v14 = vadd.f32 1.0, %v2901_v12 }
 0xb20   :  { %v1017_v15 = vadd.f32 1.0, %v2903_v13 }
 0xb21   :  { %2904 = vrcp.f32 %v944_v14 }
 0xb22   :  { %2906 = vrcp.f32 %v1017_v15 }
 0xb2b   :  { %v2905_v31 = vpop.eup %2904 }
 0xb2c   :  { %v2907_v19 = vpop.eup %2906  ;;  %v948_v24 = vmul.f32 %v2905_v31, %v3661_v30 }
 0xb2d   :  { %v1024_v26 = vmul.f32 %v2907_v19, %v1022_v23 }
 0xb8f   :  { %v951_v17 = vpop.permute.xlu1 %950 }
 0xb90   :  { %v953_v20 = vmul.f32 %v2905_v31, %v951_v17  ;;  %v1027_v21 = vpop.permute.xlu0 %1026 }
 0xb91   :  { %v1029_v22 = vmul.f32 %v2907_v19, %v1027_v21 }
 0xb92   :  { %955 = vrot.lane.b32.xlu1 %v953_v20, %s3277_s14 }
 0xb93   :  { %1031 = vrot.lane.b32.xlu0 %v1029_v22, %s3277_s14 }
 0xc04   :  { %v956_v25 = vpop.permute.xlu1 %955 }
 0xc05   :  { %v3705_v27 = vadd.f32 %v956_v25, %v948_v24  ;;  %v1032_v28 = vpop.permute.xlu0 %1031 }
 0xc06   :  { %v3707_v29 = vadd.f32 %v1032_v28, %v1024_v26 }
 0xc07   :  { %2908 = vtanh.f32 %v3705_v27 }
 0xc08   :  { %2910 = vtanh.f32 %v3707_v29 }
 0xc11   :  { %v2909_v32 = vpop.eup %2908 }
 0xc12   :  { %v2911_v33 = vpop.eup %2910  ;;  %961 = vrot.lane.b32.xlu1 %v2909_v32, %s4097_s27 }
 0xc13   :  { %1037 = vrot.lane.b32.xlu0 %v2911_v33, %s4097_s27 }
 0xc84   :  { %v962_v35 = vpop.permute.xlu1 %961 }
 0xc85   :  { %v3713_v36 = vmul.f32 %v2905_v31, %v962_v35  ;;  %v1038_v30 = vpop.permute.xlu0 %1037 }
 0xc86   :  { %v1040_v37 = vmul.f32 %v2907_v19, %v1038_v30  ;;  %v1215_v19 = vrot.slane %v3707_v29, 6 }
 0xc87   :  { %v1042_v38 = vpack.c.bf16 %v3713_v36, %v3713_v36 }
 0xc88   :  { %v1041_v39 = vpack.c.bf16 %v1040_v37, %v1040_v37 }
 0xc89   :  { %1044 = vrot.lane.b32.xlu0 %v1042_v38, %s3277_s14 }
 0xc8a   :  { %v1090_v41 = vrot.slane %v1041_v39, 3 }
 0xc8c   :  { %1091 = vrot.lane.b32.xlu1 %v1090_v41, %s3277_s14 }
 0xcfb   :  { %v1045_v42 = vpop.permute.xlu0 %1044 }
 0xcfc   :  { %2680 = vmatmul.mubr.msk.bf16.vlgmr.msra.gmra.mrb[24].mxu0 %vm168_vm0, %v1045_v42 }
 0xcfd   :  { %2692 = vmatpush3.bf16.msra.mxu0 %v3514_v16  ;;  %2695 = vmatprep.mubr.msk.bf16.mxu0 %vm3276_vm3, %v3275_v9 }
 0xcfe   :  { %v1092_v43 = vpop.permute.xlu1 %1091  ;;  %2693 = vmatprep.subr.bf16.mxu0 %v3275_v9 }
 0xcff   :  { %2688 = vmatmul.mubr.msk.bf16.vlgmr.msra.gmra.mrb[24].mxu1 %vm168_vm0, %v1092_v43 }
 0xd00   :  { %2700 = vmatpush3.bf16.msra.mxu1 %v3558_v49  ;;  %2703 = vmatprep.mubr.msk.bf16.mxu1 %vm3276_vm3, %v3275_v9 }
 0xd01   :  { %2694 = vmatpush3.bf16.msra.mxu0 %v3523_v18  ;;  %2701 = vmatprep.subr.bf16.mxu1 %v3275_v9 }
 0xd02   :  { %2707 = vmatprep.subr.bf16.mxu0 %v3275_v9 }
 0xd04   :  { %2696 = vmatmul.mubr.msk.bf16.vlgmr.msra.gmra.mrb[28].mxu0 %vm168_vm0, %v1092_v43  ;;  %2702 = vmatpush3.bf16.msra.mxu1 %v3566_v51 }
 0xd05   :  { %2708 = vmatpush3.bf16.msra.mxu0 %v3563_v50  ;;  %2715 = vmatprep.subr.bf16.mxu1 %v3275_v9 }
 0xd06   :  { %2709 = vmatprep.subr.bf16.mxu0 %v3275_v9  ;;  %2711 = vmatprep.mubr.msk.bf16.mxu0 %vm3276_vm3, %v3275_v9 }
 0xd09   :  { %2710 = vmatpush3.bf16.msra.mxu0 %v3576_v53 }
 0xd0a   :  { %2723 = vmatprep.subr.bf16.mxu0 %v3275_v9 }
 0xdcf   :  { %v1083_v44 = vpop.f32.mrb[24].mxu0 }
 0xdd0   :  { %v2681_v46 = vpop.f32.mrb[25].mxu0 }
 0xdd1   :  { %v1086_v47 = vpop.f32.mrb[26].mxu0 }
 0xdd2   :  { %v1130_v48 = vpop.f32.mrb[24].mxu1  ;;  %v2682_v52 = vpop.f32.mrb[27].mxu0 }
 0xdd3   :  { %v1131_v54 = vadd.f32 %v1130_v48, %v1083_v44  ;;  %v2689_v55 = vpop.f32.mrb[25].mxu1 }
 0xdd4   :  { %v1133_v56 = vpop.f32.mrb[26].mxu1 }
 0xdd5   :  { %v1136_v57 = vadd.f32 %v3606_v0, %v1131_v54  ;;  %v2690_v58 = vpop.f32.mrb[27].mxu1 }
 0xdd7   :  { %2912 = vtanh.f32 %v1136_v57  ;;  %v1200_v59 = vpop.f32.mrb[28].mxu0  ;;  %v2457_v3 = vmul.f32 -1.442695, %v1136_v57 }
 0xdd8   :  { %v1206_v60 = vadd.f32 %v1200_v59, %v3546_v34  ;;  %v2697_v61 = vpop.f32.mrb[29].mxu0 }
 0xdd9   :  { %v1203_v62 = vpop.f32.mrb[30].mxu0 }
 0xdda   :  { %2914 = vtanh.f32 %v1206_v60  ;;  %v2698_v63 = vpop.f32.mrb[31].mxu0  ;;  %v2459_v4 = vmul.f32 -1.442695, %v1206_v60 }
 0xddb   :  { %2916 = vpow2.f32 %v2457_v3 }
 0xddc   :  { %2918 = vpow2.f32 %v2459_v4 }
 0xde1   :  { %v2913_v1 = vpop.eup %2912 }
 0xde2   :  { %1146 = vrot.lane.b32.xlu0 %v2913_v1, %s4097_s27 }
 0xde4   :  { %v2915_v2 = vpop.eup %2914 }
 0xde5   :  { %1219 = vrot.lane.b32.xlu1 %v2915_v2, %s4097_s27  ;;  %v2917_v5 = vpop.eup %2916 }
 0xde6   :  { %v2919_v6 = vpop.eup %2918  ;;  %v1140_v7 = vadd.f32 1.0, %v2917_v5 }
 0xde7   :  { %v1210_v8 = vadd.f32 1.0, %v2919_v6 }
 0xde8   :  { %2920 = vrcp.f32 %v1140_v7 }
 0xde9   :  { %2922 = vrcp.f32 %v1210_v8 }
 0xdf2   :  { %v2921_v10 = vpop.eup %2920 }
 0xdf3   :  { %v2923_v14 = vpop.eup %2922  ;;  %v1144_v17 = vmul.f32 %v2921_v10, %v3705_v27 }
 0xdf4   :  { %v1217_v22 = vmul.f32 %v2923_v14, %v1215_v19 }
 0xe54   :  { %v1147_v12 = vpop.permute.xlu0 %1146 }
 0xe55   :  { %v1149_v13 = vmul.f32 %v2921_v10, %v1147_v12 }
 0xe57   :  { %1151 = vrot.lane.b32.xlu0 %v1149_v13, %s3277_s14  ;;  %v1220_v15 = vpop.permute.xlu1 %1219 }
 0xe58   :  { %v1222_v31 = vmul.f32 %v2923_v14, %v1220_v15 }
 0xe5a   :  { %1224 = vrot.lane.b32.xlu1 %v1222_v31, %s3277_s14 }
 0xec9   :  { %v1152_v20 = vpop.permute.xlu0 %1151 }
 0xeca   :  { %v3748_v21 = vadd.f32 %v1152_v20, %v1144_v17 }
 0xecc   :  { %2924 = vtanh.f32 %v3748_v21  ;;  %v1225_v23 = vpop.permute.xlu1 %1224 }
 0xecd   :  { %v3751_v24 = vadd.f32 %v1225_v23, %v1217_v22 }
 0xecf   :  { %2926 = vtanh.f32 %v3751_v24  ;;  %v1410_v31 = vrot.slane %v3751_v24, 6 }
 0xed6   :  { %v2925_v25 = vpop.eup %2924 }
 0xed7   :  { %1157 = vrot.lane.b32.xlu0 %v2925_v25, %s4097_s27 }
 0xed9   :  { %v2927_v26 = vpop.eup %2926 }
 0xeda   :  { %1230 = vrot.lane.b32.xlu1 %v2927_v26, %s4097_s27 }
 0xf49   :  { %v1158_v27 = vpop.permute.xlu0 %1157 }
 0xf4a   :  { %v3756_v28 = vmul.f32 %v2921_v10, %v1158_v27 }
 0xf4c   :  { %v1235_v29 = vpack.c.bf16 %v3756_v28, %v3756_v28  ;;  %v1231_v32 = vpop.permute.xlu1 %1230 }
 0xf4d   :  { %v1233_v33 = vmul.f32 %v2923_v14, %v1231_v32 }
 0xf4e   :  { %1237 = vrot.lane.b32.xlu0 %v1235_v29, %s3277_s14 }
 0xf4f   :  { %v1234_v35 = vpack.c.bf16 %v1233_v33, %v1233_v33 }
 0xf51   :  { %1283 = vrot.lane.b32.xlu1 %v1234_v35, %s3277_s14 }
 0xfc0   :  { %v1238_v30 = vpop.permute.xlu0 %1237 }
 0xfc1   :  { %2704 = vmatmul.mubr.msk.bf16.vlgmr.msra.gmra.mrb[28].mxu1 %vm168_vm0, %v1238_v30 }
 0xfc2   :  { %2716 = vmatpush3.bf16.msra.mxu1 %v3514_v16  ;;  %2719 = vmatprep.mubr.msk.bf16.mxu1 %vm3276_vm3, %v3275_v9 }
 0xfc3   :  { %v1284_v37 = vpop.permute.xlu1 %1283  ;;  %2717 = vmatprep.subr.bf16.mxu1 %v3275_v9 }
 0xfc4   :  { %2712 = vmatmul.mubr.msk.bf16.vlgmr.msra.gmra.mrb[32].mxu0 %vm168_vm0, %v1284_v37 }
 0xfc5   :  { %2724 = vmatpush3.bf16.msra.mxu0 %v3558_v49  ;;  %2727 = vmatprep.mubr.msk.bf16.mxu0 %vm3276_vm3, %v3275_v9 }
 0xfc6   :  { %2718 = vmatpush3.bf16.msra.mxu1 %v3523_v18  ;;  %2725 = vmatprep.subr.bf16.mxu0 %v3275_v9 }
 0xfc7   :  { %2731 = vmatprep.subr.bf16.mxu1 %v3275_v9 }
 0xfc9   :  { %2720 = vmatmul.mubr.msk.bf16.vlgmr.msra.gmra.mrb[32].mxu1 %vm168_vm0, %v1284_v37  ;;  %2726 = vmatpush3.bf16.msra.mxu0 %v3566_v51 }
 0xfca   :  { %2732 = vmatpush3.bf16.msra.mxu1 %v3563_v50  ;;  %2739 = vmatprep.subr.bf16.mxu0 %v3275_v9 }
 0xfcb   :  { %2733 = vmatprep.subr.bf16.mxu1 %v3275_v9  ;;  %2735 = vmatprep.mubr.msk.bf16.mxu1 %vm3276_vm3, %v3275_v9 }
 0xfce   :  { %2734 = vmatpush3.bf16.msra.mxu1 %v3576_v53 }
 0xfcf   :  { %2747 = vmatprep.subr.bf16.mxu1 %v3275_v9 }
0x1094   :  { %v1276_v38 = vpop.f32.mrb[28].mxu1 }
0x1095   :  { %v2705_v39 = vpop.f32.mrb[29].mxu1 }
0x1096   :  { %v1279_v41 = vpop.f32.mrb[30].mxu1 }
0x1097   :  { %v2706_v42 = vpop.f32.mrb[31].mxu1  ;;  %v1322_v43 = vpop.f32.mrb[32].mxu0 }
0x1098   :  { %v1323_v44 = vadd.f32 %v1322_v43, %v1276_v38  ;;  %v2713_v46 = vpop.f32.mrb[33].mxu0 }
0x1099   :  { %v1325_v47 = vpop.f32.mrb[34].mxu0 }
0x109a   :  { %v1328_v48 = vadd.f32 %v3606_v0, %v1323_v44  ;;  %v2714_v52 = vpop.f32.mrb[35].mxu0 }
0x109c   :  { %2928 = vtanh.f32 %v1328_v48  ;;  %v1392_v54 = vpop.f32.mrb[32].mxu1  ;;  %v2462_v62 = vmul.f32 -1.442695, %v1328_v48 }
0x109d   :  { %v1399_v55 = vrot.slane %v1392_v54, 6  ;;  %v2721_v56 = vpop.f32.mrb[33].mxu1 }
0x109e   :  { %v1395_v57 = vpop.f32.mrb[34].mxu1 }
0x109f   :  { %v1401_v58 = vadd.f32 %v1399_v55, %v3546_v34  ;;  %v2722_v59 = vpop.f32.mrb[35].mxu1 }
0x10a1   :  { %2930 = vtanh.f32 %v1401_v58  ;;  %v2464_v63 = vmul.f32 -1.442695, %v1401_v58 }
0x10a2   :  { %2932 = vpow2.f32 %v2462_v62 }
0x10a3   :  { %2934 = vpow2.f32 %v2464_v63 }
0x10a6   :  { %v2929_v60 = vpop.eup %2928 }
0x10a7   :  { %1338 = vrot.lane.b32.xlu0 %v2929_v60, %s4097_s27 }
0x10ab   :  { %v2931_v61 = vpop.eup %2930 }
0x10ac   :  { %1414 = vrot.lane.b32.xlu1 %v2931_v61, %s4097_s27  ;;  %v2933_v1 = vpop.eup %2932 }
0x10ad   :  { %v1332_v2 = vadd.f32 1.0, %v2933_v1  ;;  %v2935_v3 = vpop.eup %2934 }
0x10ae   :  { %v1405_v4 = vadd.f32 1.0, %v2935_v3 }
0x10af   :  { %2936 = vrcp.f32 %v1332_v2 }
0x10b0   :  { %2938 = vrcp.f32 %v1405_v4 }
0x10b9   :  { %v2937_v5 = vpop.eup %2936 }
0x10ba   :  { %v2939_v8 = vpop.eup %2938  ;;  %v1336_v13 = vmul.f32 %v2937_v5, %v3748_v21 }
0x10bb   :  { %v1412_v17 = vmul.f32 %v2939_v8, %v1410_v31 }
0x1119   :  { %v1339_v6 = vpop.permute.xlu0 %1338 }
0x111a   :  { %v1341_v7 = vmul.f32 %v2937_v5, %v1339_v6 }
0x111c   :  { %1343 = vrot.lane.b32.xlu0 %v1341_v7, %s3277_s14 }
0x111e   :  { %v1415_v10 = vpop.permute.xlu1 %1414 }
0x111f   :  { %v1417_v12 = vmul.f32 %v2939_v8, %v1415_v10 }
0x1121   :  { %1419 = vrot.lane.b32.xlu1 %v1417_v12, %s3277_s14 }
0x118e   :  { %v1344_v14 = vpop.permute.xlu0 %1343 }
0x118f   :  { %v3790_v15 = vadd.f32 %v1344_v14, %v1336_v13 }
0x1191   :  { %2940 = vtanh.f32 %v3790_v15 }
0x1193   :  { %v1420_v19 = vpop.permute.xlu1 %1419 }
0x1194   :  { %v3794_v20 = vadd.f32 %v1420_v19, %v1412_v17 }
0x1196   :  { %2942 = vtanh.f32 %v3794_v20  ;;  %v1606_v3 = vrot.slane %v3794_v20, 6 }
0x119b   :  { %v2941_v22 = vpop.eup %2940 }
0x119c   :  { %1349 = vrot.lane.b32.xlu0 %v2941_v22, %s4097_s27 }
0x11a0   :  { %v2943_v23 = vpop.eup %2942 }
0x11a1   :  { %1425 = vrot.lane.b32.xlu1 %v2943_v23, %s4097_s27 }
0x120e   :  { %v1350_v21 = vpop.permute.xlu0 %1349 }
0x120f   :  { %v3799_v25 = vmul.f32 %v2937_v5, %v1350_v21  ;;  %v3000_v21 = vld [vmem:[%s4069_s4] sm:$0xff]  }
0x1211   :  { %v1430_v24 = vpack.c.bf16 %v3799_v25, %v3799_v25 }
0x1213   :  { %v1426_v26 = vpop.permute.xlu1 %1425  ;;  %1432 = vrot.lane.b32.xlu0 %v1430_v24, %s3277_s14 }
0x1214   :  { %v1428_v27 = vmul.f32 %v2939_v8, %v1426_v26  ;;  %v3001_v26 = vld [vmem:[#allocation6] sm:$0xff]  }
0x1216   :  { %v1429_v29 = vpack.c.bf16 %v1428_v27, %v1428_v27  ;;  %v3002_v27 = vld [vmem:[%s4069_s4 + $0x8] sm:$0xff]  }
0x1218   :  { %v1478_v32 = vrot.slane %v1429_v29, 1  ;;  %v3003_v29 = vld [vmem:[#allocation6 + $0x8] sm:$0xff]  }
0x121a   :  { %1479 = vrot.lane.b32.xlu1 %v1478_v32, %s3277_s14  ;;  %v3004_v32 = vld [vmem:[%s4071_s6] sm:$0xff]  }
0x1285   :  { %v1433_v33 = vpop.permute.xlu0 %1432 }
0x1286   :  { %2728 = vmatmul.mubr.msk.bf16.vlgmr.msra.gmra.mrb[36].mxu0 %vm168_vm0, %v1433_v33  ;;  %v3005_v33 = vld [vmem:[%s4071_s6 + $0x8] sm:$0xff]   ;;  %s3278_s6 = smov 96  }
0x1287   :  { %2740 = vmatpush3.bf16.msra.mxu0 %v3514_v16  ;;  %2743 = vmatprep.mubr.msk.bf16.mxu0 %vm3276_vm3, %v3275_v9 }
0x1288   :  { %2741 = vmatprep.subr.bf16.mxu0 %v3275_v9 }
0x128b   :  { %2742 = vmatpush3.bf16.msra.mxu0 %v3523_v18 }
0x128c   :  { %v1480_v35 = vpop.permute.xlu1 %1479  ;;  %2755 = vmatprep.subr.bf16.mxu0 %v3275_v9 }
0x128d   :  { %2736 = vmatmul.mubr.msk.bf16.vlgmr.msra.gmra.mrb[36].mxu1 %vm168_vm0, %v1480_v35 }
0x128e   :  { %2744 = vmatmul.mubr.msk.bf16.vlgmr.msra.gmra.mrb[40].mxu0 %vm168_vm0, %v1480_v35  ;;  %2748 = vmatpush3.bf16.msra.mxu1 %v3558_v49 }
0x128f   :  { %2749 = vmatprep.subr.bf16.mxu1 %v3275_v9  ;;  %2756 = vmatpush3.bf16.msra.mxu0 %v3563_v50 }
0x1290   :  { %2751 = vmatprep.mubr.msk.bf16.mxu1 %vm3276_vm3, %v3275_v9  ;;  %2757 = vmatprep.subr.bf16.mxu0 %v3275_v9 }
0x1291   :  { %2759 = vmatprep.mubr.msk.bf16.mxu0 %vm3276_vm3, %v3275_v9 }
0x1292   :  { %2750 = vmatpush3.bf16.msra.mxu1 %v3566_v51 }
0x1293   :  { %2763 = vmatprep.subr.bf16.mxu1 %v3275_v9  ;;  %2758 = vmatpush3.bf16.msra.mxu0 %v3576_v53 }
0x1294   :  { %2771 = vmatprep.subr.bf16.mxu0 %v3275_v9 }
0x1359   :  { %v1471_v16 = vpop.f32.mrb[36].mxu0 }
0x135a   :  { %v2729_v18 = vpop.f32.mrb[37].mxu0 }
0x135b   :  { %v1474_v49 = vpop.f32.mrb[38].mxu0 }
0x135c   :  { %v2730_v50 = vpop.f32.mrb[39].mxu0 }
0x1360   :  { %v1518_v30 = vpop.f32.mrb[36].mxu1 }
0x1361   :  { %v1519_v37 = vadd.f32 %v1518_v30, %v1471_v16  ;;  %v2737_v38 = vpop.f32.mrb[37].mxu1  ;;  %v1588_v39 = vpop.f32.mrb[40].mxu0 }
0x1362   :  { %v1521_v41 = vpop.f32.mrb[38].mxu1  ;;  %v1595_v42 = vrot.slane %v1588_v39, 4  ;;  %v2745_v43 = vpop.f32.mrb[41].mxu0 }
0x1363   :  { %v1524_v44 = vadd.f32 %v3606_v0, %v1519_v37  ;;  %v2738_v51 = vpop.f32.mrb[39].mxu1  ;;  %v1591_v46 = vpop.f32.mrb[42].mxu0 }
0x1364   :  { %v1597_v47 = vadd.f32 %v1595_v42, %v3546_v34  ;;  %v2746_v53 = vpop.f32.mrb[43].mxu0 }
0x1365   :  { %2944 = vtanh.f32 %v1524_v44  ;;  %v2467_v54 = vmul.f32 -1.442695, %v1524_v44 }
0x1366   :  { %2946 = vtanh.f32 %v1597_v47  ;;  %v2469_v55 = vmul.f32 -1.442695, %v1597_v47 }
0x1367   :  { %2948 = vpow2.f32 %v2467_v54 }
0x1368   :  { %2950 = vpow2.f32 %v2469_v55 }
0x136f   :  { %v2945_v48 = vpop.eup %2944 }
0x1370   :  { %v2947_v52 = vpop.eup %2946  ;;  %1534 = vrot.lane.b32.xlu0 %v2945_v48, %s4097_s27 }
0x1371   :  { %1610 = vrot.lane.b32.xlu1 %v2947_v52, %s4097_s27  ;;  %v2949_v56 = vpop.eup %2948 }
0x1372   :  { %v2951_v57 = vpop.eup %2950  ;;  %v1528_v58 = vadd.f32 1.0, %v2949_v56 }
0x1373   :  { %v1601_v59 = vadd.f32 1.0, %v2951_v57 }
0x1374   :  { %2952 = vrcp.f32 %v1528_v58 }
0x1375   :  { %2954 = vrcp.f32 %v1601_v59 }
0x137e   :  { %v2953_v60 = vpop.eup %2952 }
0x137f   :  { %v2955_v62 = vpop.eup %2954  ;;  %v1532_v4 = vmul.f32 %v2953_v60, %v3790_v15 }
0x1380   :  { %v1608_v6 = vmul.f32 %v2955_v62, %v1606_v3 }
0x13e2   :  { %v1535_v61 = vpop.permute.xlu0 %1534 }
0x13e3   :  { %v1537_v63 = vmul.f32 %v2953_v60, %v1535_v61  ;;  %v1611_v1 = vpop.permute.xlu1 %1610 }
0x13e4   :  { %v1613_v2 = vmul.f32 %v2955_v62, %v1611_v1 }
0x13e5   :  { %1539 = vrot.lane.b32.xlu0 %v1537_v63, %s3277_s14 }
0x13e6   :  { %1615 = vrot.lane.b32.xlu1 %v1613_v2, %s3277_s14 }
0x1457   :  { %v1540_v5 = vpop.permute.xlu0 %1539 }
0x1458   :  { %v3834_v7 = vadd.f32 %v1540_v5, %v1532_v4  ;;  %v1616_v8 = vpop.permute.xlu1 %1615 }
0x1459   :  { %v3836_v10 = vadd.f32 %v1616_v8, %v1608_v6 }
0x145a   :  { %2956 = vtanh.f32 %v3834_v7 }
0x145b   :  { %2958 = vtanh.f32 %v3836_v10  ;;  %v1802_v3 = vrot.slane %v3836_v10, 6 }
0x1464   :  { %v2957_v12 = vpop.eup %2956 }
0x1465   :  { %v2959_v13 = vpop.eup %2958  ;;  %1545 = vrot.lane.b32.xlu0 %v2957_v12, %s4097_s27 }
0x1466   :  { %1621 = vrot.lane.b32.xlu1 %v2959_v13, %s4097_s27 }
0x14d7   :  { %v1546_v14 = vpop.permute.xlu0 %1545 }
0x14d8   :  { %v3842_v31 = vmul.f32 %v2953_v60, %v1546_v14  ;;  %v1622_v15 = vpop.permute.xlu1 %1621 }
0x14d9   :  { %v1624_v17 = vmul.f32 %v2955_v62, %v1622_v15 }
0x14da   :  { %v1626_v19 = vpack.c.bf16 %v3842_v31, %v3842_v31 }
0x14db   :  { %v1625_v20 = vpack.c.bf16 %v1624_v17, %v1624_v17 }
0x14dc   :  { %1628 = vrot.lane.b32.xlu0 %v1626_v19, %s3277_s14 }
0x14dd   :  { %v1674_v22 = vrot.slane %v1625_v20, 2 }
0x14df   :  { %1675 = vrot.lane.b32.xlu1 %v1674_v22, %s3277_s14 }
0x154e   :  { %v1629_v23 = vpop.permute.xlu0 %1628 }
0x154f   :  { %2752 = vmatmul.mubr.msk.bf16.vlgmr.msra.gmra.mrb[40].mxu1 %vm168_vm0, %v1629_v23 }
0x1550   :  { %2764 = vmatpush3.bf16.msra.mxu1 %v3000_v21  ;;  %2767 = vmatprep.mubr.msk.bf16.mxu1 %vm3276_vm3, %v3275_v9 }
0x1551   :  { %v1676_v24 = vpop.permute.xlu1 %1675  ;;  %2765 = vmatprep.subr.bf16.mxu1 %v3275_v9 }
0x1552   :  { %2760 = vmatmul.mubr.msk.bf16.vlgmr.msra.gmra.mrb[44].mxu0 %vm168_vm0, %v1676_v24 }
0x1553   :  { %2772 = vmatpush3.bf16.msra.mxu0 %v3001_v26  ;;  %2775 = vmatprep.mubr.msk.bf16.mxu0 %vm3276_vm3, %v3275_v9 }
0x1554   :  { %2766 = vmatpush3.bf16.msra.mxu1 %v3002_v27  ;;  %2773 = vmatprep.subr.bf16.mxu0 %v3275_v9 }
0x1555   :  { %2779 = vmatprep.subr.bf16.mxu1 %v3275_v9 }
0x1557   :  { %2768 = vmatmul.mubr.msk.bf16.vlgmr.msra.gmra.mrb[44].mxu1 %vm168_vm0, %v1676_v24  ;;  %2774 = vmatpush3.bf16.msra.mxu0 %v3003_v29 }
0x1558   :  { %2780 = vmatpush3.bf16.msra.mxu1 %v3004_v32  ;;  %2783 = vmatprep.mubr.msk.bf16.mxu1 %vm3276_vm3, %v3275_v9 }
0x1559   :  { %2781 = vmatprep.subr.bf16.mxu1 %v3275_v9  ;;  %2787 = vmatprep.subr.bf16.mxu0 %v3275_v9 }
0x155c   :  { %2782 = vmatpush3.bf16.msra.mxu1 %v3005_v33 }
0x155d   :  { %2793 = vmatprep.subr.bf16.mxu1 %v3275_v9 }
0x1622   :  { %v1667_v35 = vpop.f32.mrb[40].mxu1 }
0x1623   :  { %v2753_v16 = vpop.f32.mrb[41].mxu1 }
0x1624   :  { %v1670_v18 = vpop.f32.mrb[42].mxu1 }
0x1625   :  { %v2754_v49 = vpop.f32.mrb[43].mxu1  ;;  %v1714_v50 = vpop.f32.mrb[44].mxu0 }
0x1626   :  { %v1715_v30 = vadd.f32 %v1714_v50, %v1667_v35  ;;  %v2761_v37 = vpop.f32.mrb[45].mxu0  ;;  %v3006_v35 = vld [vmem:[#allocation8] ss:$0 sm:$0xff] }
0x1627   :  { %v1717_v38 = vpop.f32.mrb[46].mxu0 }
0x1628   :  { %v1720_v39 = vadd.f32 %v3606_v0, %v1715_v30  ;;  %v2762_v41 = vpop.f32.mrb[47].mxu0 }
0x162a   :  { %2960 = vtanh.f32 %v1720_v39  ;;  %v1784_v42 = vpop.f32.mrb[44].mxu1  ;;  %v2472_v52 = vmul.f32 -1.442695, %v1720_v39 }
0x162b   :  { %v1791_v43 = vrot.slane %v1784_v42, 2  ;;  %v2769_v44 = vpop.f32.mrb[45].mxu1 }
0x162c   :  { %v1787_v51 = vpop.f32.mrb[46].mxu1 }
0x162d   :  { %v1793_v46 = vadd.f32 %v1791_v43, %v3546_v34  ;;  %v2770_v47 = vpop.f32.mrb[47].mxu1 }
0x162f   :  { %2962 = vtanh.f32 %v1793_v46  ;;  %v2474_v54 = vmul.f32 -1.442695, %v1793_v46 }
0x1630   :  { %2964 = vpow2.f32 %v2472_v52 }
0x1631   :  { %2966 = vpow2.f32 %v2474_v54 }
0x1634   :  { %v2961_v53 = vpop.eup %2960 }
0x1635   :  { %1730 = vrot.lane.b32.xlu1 %v2961_v53, %s4097_s27 }
0x1639   :  { %v2963_v48 = vpop.eup %2962 }
0x163a   :  { %1806 = vrot.lane.b32.xlu0 %v2963_v48, %s4097_s27  ;;  %v2965_v0 = vpop.eup %2964 }
0x163b   :  { %v1724_v55 = vadd.f32 1.0, %v2965_v0  ;;  %v2967_v56 = vpop.eup %2966 }
0x163c   :  { %v1797_v57 = vadd.f32 1.0, %v2967_v56 }
0x163d   :  { %2968 = vrcp.f32 %v1724_v55 }
0x163e   :  { %2970 = vrcp.f32 %v1797_v57 }
0x1647   :  { %v2969_v58 = vpop.eup %2968 }
0x1648   :  { %v2971_v60 = vpop.eup %2970  ;;  %v1728_v63 = vmul.f32 %v2969_v58, %v3834_v7 }
0x1649   :  { %v1804_v4 = vmul.f32 %v2971_v60, %v1802_v3 }
0x16a7   :  { %v1731_v34 = vpop.permute.xlu1 %1730 }
0x16a8   :  { %v1733_v59 = vmul.f32 %v2969_v58, %v1731_v34 }
0x16aa   :  { %1735 = vrot.lane.b32.xlu1 %v1733_v59, %s3277_s14  ;;  %v2049_v59 = vld [vmem:[#allocation11 + $0x8] sm:$0xff] }
0x16ac   :  { %v1807_v61 = vpop.permute.xlu0 %1806 }
0x16ad   :  { %v1809_v62 = vmul.f32 %v2971_v60, %v1807_v61  ;;  %v1969_v61 = vld [vmem:[#allocation9 + $0x8] sm:$0x3] }
0x16af   :  { %1811 = vrot.lane.b32.xlu0 %v1809_v62, %s3277_s14 }
0x171c   :  { %v1736_v1 = vpop.permute.xlu1 %1735 }
0x171d   :  { %v1738_v2 = vadd.f32 %v1736_v1, %v1728_v63  ;;  %v2161_v1 = vld [vmem:[#allocation14] sm:$0xff] }
0x171f   :  { %2972 = vtanh.f32 %v1738_v2 }
0x1721   :  { %v1812_v5 = vpop.permute.xlu0 %1811 }
0x1722   :  { %v3883_v6 = vadd.f32 %v1812_v5, %v1804_v4 }
0x1724   :  { %2974 = vtanh.f32 %v3883_v6 }
0x1729   :  { %v2973_v8 = vpop.eup %2972 }
0x172a   :  { %1741 = vrot.lane.b32.xlu1 %v2973_v8, %s4097_s27 }
0x172e   :  { %v2975_v12 = vpop.eup %2974 }
0x172f   :  { %1817 = vrot.lane.b32.xlu0 %v2975_v12, %s4097_s27 }
0x179c   :  { %v1742_v13 = vpop.permute.xlu1 %1741 }
0x179d   :  { %v1744_v14 = vmul.f32 %v2969_v58, %v1742_v13  ;;  %v2048_v58 = vld [vmem:[#allocation11] sm:$0xff] }
0x179e   :  { %v2050_v62 = vpack.c.bf16 %v2049_v59, %v2048_v58 }
0x179f   :  { %v1822_v7 = vpack.c.bf16 %v1744_v14, %v1744_v14 }
0x17a1   :  { %v1818_v15 = vpop.permute.xlu0 %1817  ;;  %1824 = vrot.lane.b32.xlu0 %v1822_v7, %s3277_s14 }
0x17a2   :  { %v1820_v10 = vmul.f32 %v2971_v60, %v1818_v15  ;;  %v1968_v60 = vld [vmem:[#allocation9] sm:$0xff] }
0x17a3   :  { %v1970_v63 = vpack.c.bf16 %v1969_v61, %v1968_v60 }
0x17a4   :  { %v1821_v17 = vpack.c.bf16 %v1820_v10, %v1820_v10 }
0x17a6   :  { %v1870_v19 = vrot.slane %v1821_v17, 3 }
0x17a8   :  { %1871 = vrot.lane.b32.xlu1 %v1870_v19, %s3277_s14 }
0x1813   :  { %v1825_v20 = vpop.permute.xlu0 %1824 }
0x1814   :  { %2776 = vmatmul.mubr.msk.bf16.vlgmr.msra.gmra.mrb[48].mxu0 %vm168_vm0, %v1825_v20 }
0x1815   :  { %2789 = vmatprep.mubr.msk.bf16.mxu0 %vm3276_vm3, %v3275_v9 }
0x181a   :  { %v1872_v22 = vpop.permute.xlu1 %1871 }
0x181b   :  { %2784 = vmatmul.mubr.msk.bf16.vlgmr.msra.gmra.mrb[48].mxu1 %vm168_vm0, %v1872_v22 }
0x181c   :  { %2795 = vmatprep.mubr.msk.bf16.mxu1 %vm3276_vm3, %v3275_v9 }
0x18e7   :  { %v1863_v23 = vpop.f32.mrb[48].mxu0 }
0x18e8   :  { %v2777_v21 = vpop.f32.mrb[49].mxu0 }
0x18e9   :  { %v1866_v24 = vpop.f32.mrb[50].mxu0 }
0x18ea   :  { %v2778_v26 = vpop.f32.mrb[51].mxu0 }
0x18ee   :  { %v1910_v27 = vpop.f32.mrb[48].mxu1 }
0x18ef   :  { %v1911_v29 = vadd.f32 %v1910_v27, %v1863_v23  ;;  %v2785_v32 = vpop.f32.mrb[49].mxu1  ;;  %v2206_v27 = vld [vmem:[%s4080_s15] sm:$0xff] }
0x18f0   :  { %v1913_v33 = vpop.f32.mrb[50].mxu1 }
0x18f1   :  { %v1916_v16 = vadd.f32 %v3006_v35, %v1911_v29  ;;  %v2786_v18 = vpop.f32.mrb[51].mxu1  ;;  %v2207_v29 = vld [vmem:[%s4080_s15 + $0x8] sm:$0xff] }
0x18f2   :  { %v2208_v18 = vpack.c.bf16 %v2207_v29, %v2206_v27 }
0x18f3   :  { %2976 = vtanh.f32 %v1916_v16  ;;  %v2477_v50 = vmul.f32 -1.442695, %v1916_v16 }
0x18f5   :  { %2978 = vpow2.f32 %v2477_v50 }
0x18fd   :  { %v2977_v49 = vpop.eup %2976 }
0x18fe   :  { %1926 = vrot.lane.b32.xlu0 %v2977_v49, %s4097_s27 }
0x18ff   :  { %v2979_v30 = vpop.eup %2978 }
0x1900   :  { %v1920_v37 = vadd.f32 1.0, %v2979_v30 }
0x1902   :  { %2980 = vrcp.f32 %v1920_v37 }
0x190c   :  { %v2981_v38 = vpop.eup %2980 }
0x190d   :  { %v1924_v42 = vmul.f32 %v2981_v38, %v1738_v2  ;;  %v2162_v2 = vpack.c.bf16 %v2161_v1, %v2161_v1 }
0x1970   :  { %v1927_v39 = vpop.permute.xlu0 %1926 }
0x1971   :  { %v1929_v41 = vmul.f32 %v2981_v38, %v1927_v39 }
0x1973   :  { %1931 = vrot.lane.b32.xlu1 %v1929_v41, %s3277_s14 }
0x1977   :  { %573 = vrot.lane.b32.xlu1 %v3627_v45, %s3277_s14 }
0x197b   :  { %966 = vrot.lane.b32.xlu1 %v3713_v36, %s3277_s14 }
0x197f   :  { %1354 = vrot.lane.b32.xlu1 %v3799_v25, %s3277_s14 }
0x1983   :  { %1746 = vrot.lane.b32.xlu1 %v1744_v14, %s3277_s14 }
0x19e5   :  { %v1932_v43 = vpop.permute.xlu1 %1931 }
0x19e6   :  { %v1934_v44 = vadd.f32 %v1932_v43, %v1924_v42 }
0x19e8   :  { %2982 = vtanh.f32 %v1934_v44 }
0x19e9   :  { %v574_v51 = vpop.permute.xlu1 %573 }
0x19ea   :  { %577 = vst.msk [vmem:[#allocation2] sm:$0x3] %vm576_vm4, %v574_v51 }
0x19ed   :  { %v967_v46 = vpop.permute.xlu1 %966 }
0x19ee   :  { %969 = vst.msk [vmem:[#allocation2 + $0x4] sm:$0x3] %vm576_vm4, %v967_v46 }
0x19f1   :  { %v1355_v45 = vpop.permute.xlu1 %1354 }
0x19f2   :  { %v2983_v47 = vpop.eup %2982  ;;  %1357 = vst.msk [vmem:[#allocation2 + $0x8] sm:$0x3] %vm576_vm4, %v1355_v45 }
0x19f3   :  { %1937 = vrot.lane.b32.xlu0 %v2983_v47, %s4097_s27  ;;  %s4098_s27 = sld [smem:[#allocation29_spill]] }
0x19f5   :  { %v1747_v36 = vpop.permute.xlu1 %1746 }
0x19f6   :  { %1749 = vst.msk [vmem:[#allocation2 + $0xc] sm:$0x3] %vm576_vm4, %v1747_v36 }
0x19f7   :  { %770 = vrot.lane.b32.xlu0 %v3670_v40, %s3277_s14 }
0x19f9   :  { %v3952_v36 = vld [vmem:[%s4098_s27] sm:$0x1] }
0x19fa   :  { %vm2289_vm10 = vcmp.ge.s32.totalorder %v3952_v36, 8  ;;  %vm2290_vm11 = vcmp.lt.s32.totalorder %v3952_v36, 16  ;;  %vm2288_vm13 = vcmp.lt.s32.totalorder %v3952_v36, 8 }
0x19fb   :  { %1162 = vrot.lane.b32.xlu0 %v3756_v28, %s3277_s14  ;;  %vm3956_vm12 = vmand %vm2289_vm10, %vm2290_vm11 }
0x19ff   :  { %1550 = vrot.lane.b32.xlu0 %v3842_v31, %s3277_s14 }
0x1a65   :  { %v1938_v25 = vpop.permute.xlu0 %1937 }
0x1a66   :  { %v1940_v53 = vmul.f32 %v2981_v38, %v1938_v25 }
0x1a68   :  { %1942 = vrot.lane.b32.xlu0 %v1940_v53, %s3277_s14 }
0x1a69   :  { %v771_v48 = vpop.permute.xlu0 %770 }
0x1a6a   :  { %773 = vst.msk [vmem:[#allocation2 + $0x2] sm:$0x3] %vm576_vm4, %v771_v48 }
0x1a6c   :  { %1947 = vrot.lane.b32.xlu0 %v1820_v10, %s3277_s14 }
0x1a6d   :  { %v1163_v52 = vpop.permute.xlu0 %1162 }
0x1a6e   :  { %1165 = vst.msk [vmem:[#allocation2 + $0x6] sm:$0x3] %vm576_vm4, %v1163_v52 }
0x1a70   :  { %1955 = vrot.lane.b32.xlu0 %v3883_v6, %s3278_s6  ;;  %v2095_v6 = vld [vmem:[#allocation12] sm:$0xff] }
0x1a71   :  { %v1551_v40 = vpop.permute.xlu0 %1550  ;;  %v2096_v19 = vpack.c.bf16 %v2095_v6, %v2095_v6 }
0x1a72   :  { %1553 = vst.msk [vmem:[#allocation2 + $0xa] sm:$0x3] %vm576_vm4, %v1551_v40  ;;  %v3961_v40 = vshrl.u32 %v150_v11, 7 }
0x1a74   :  { %1960 = vrot.lane.b32.xlu0 %v1934_v44, %s3278_s6 }
0x1a75   :  { %v1965_v0 = vld [vmem:[#allocation2] sm:$0xff] }
0x1ada   :  { %v1943_v28 = vpop.permute.xlu0 %1942 }
0x1adb   :  { %1945 = vst.msk [vmem:[#allocation2 + $0xe] sm:$0x3] %vm576_vm4, %v1943_v28  ;;  %1953 = vst.msk [vmem:[#allocation18 + $0x2] sm:$0x3] %vm576_vm4, %v1943_v28  ;;  %v3279_v28 = vmov 9  }
0x1ade   :  { %v1948_v31 = vpop.permute.xlu0 %1947 }
0x1adf   :  { %1951 = vst.msk [vmem:[#allocation18 - $0x6] sm:$0xc0] %vm1950_vm5, %v1948_v31  ;;  %v2292_v31 = vsel %vm3956_vm12, 8, %v3279_v28 }
0x1ae2   :  { %v1956_v54 = vpop.permute.xlu0 %1955  ;;  %v1966_v55 = vld [vmem:[#allocation2 + $0x8] sm:$0xff] }
0x1ae3   :  { %1958 = vst.msk [vmem:[#allocation19 - $0x6] sm:$0xc0] %vm1950_vm5, %v1956_v54  ;;  %v1967_v56 = vpack.c.bf16 %v1966_v55, %v1965_v0  ;;  %v3967_v54 = vsub.s32 0, %v3961_v40  ;;  %v2293_v0 = vsel %vm2288_vm13, %v3952_v36, %v2292_v31  ;;  %v3973_v55 = vadd.s32 8, %v3961_v40 }
0x1ae5   :  { %v1975_v57 = vsel %vm168_vm0, %v1967_v56, 0  ;;  %v2300_v11 = vrot.slane %v2293_v0, %v3967_v54 }
0x1ae6   :  { %2788 = vmatpush3.bf16.xpose.msra.mxu0 %v1975_v57  ;;  %2794 = vmatpush3.bf16.xpose.msra.mxu1 %v1975_v57  ;;  %v1961_v34 = vpop.permute.xlu0 %1960 }
0x1ae7   :  { %1964 = vst.msk [vmem:[#allocation19 + $0x2] sm:$0x3] %vm576_vm4, %v1961_v34  ;;  %2805 = vmatprep.subr.bf16.mxu1 %v3275_v9  ;;  %2799 = vmatprep.subr.bf16.mxu0 %v3275_v9  ;;  %vm2301_vm14 = vcmp.eq.s32.totalorder %v3961_v40, %v2300_v11  ;;  %vm2302_vm15 = vcmp.eq.s32.totalorder %v3973_v55, %v2300_v11 }
0x1aed   :  { %2796 = vmatmul.mubr.msk.bf16.vlgmr.msra.gmra.mrb[52].mxu1 %vm168_vm0, %v2050_v62  ;;  %2790 = vmatmul.mubr.msk.bf16.vlgmr.msra.gmra.mrb[52].mxu0 %vm168_vm0, %v1970_v63 }
0x1aee   :  { %2806 = vmatpush3.bf16.xpose.msra.mxu1 %v1975_v57  ;;  %2807 = vmatprep.mubr.msk.bf16.mxu1 %vm3276_vm3, %v3275_v9 }
0x1aef   :  { %2801 = vmatprep.mubr.msk.bf16.mxu0 %vm3276_vm3, %v3275_v9 }
0x1af5   :  { %2808 = vmatmul.mubr.msk.bf16.vlgmr.msra.gmra.mrb[56].mxu1 %vm168_vm0, %v2162_v2 }
0x1bc0   :  { %v2088_v3 = vpop.f32.mrb[52].mxu1  ;;  %v2011_v4 = vpop.f32.mrb[52].mxu0 }
0x1bc1   :  { %v2797_v5 = vpop.f32.mrb[53].mxu1  ;;  %v2019_v8 = vsel %vm2018_vm6, %v2011_v4, -inf  ;;  %v2791_v12 = vpop.f32.mrb[53].mxu0 }
0x1bc2   :  { %v2091_v13 = vpop.f32.mrb[54].mxu1  ;;  %v2014_v14 = vpop.f32.mrb[54].mxu0 }
0x1bc3   :  { %v2097_v7 = vpack.c.bf16 %v2091_v13, %v2088_v3  ;;  %v2798_v15 = vpop.f32.mrb[55].mxu1  ;;  %v2021_v10 = vsel %vm2020_vm7, %v2014_v14, -inf  ;;  %v2792_v17 = vpop.f32.mrb[55].mxu0 }
0x1bc4   :  { %v2022_v20 = vmax.f32 %v2019_v8, %v2021_v10 }
0x1bc5   :  { %2800 = vmatpush3.bf16.msra.mxu0 %v2097_v7 }
0x1bc6   :  { %2811 = vmatprep.subr.bf16.mxu0 %v3275_v9  ;;  %v2023_v22 = vrot.slane %v2022_v20, 4 }
0x1bc8   :  { %2802 = vmatmul.mubr.msk.bf16.vlgmr.msra.gmra.mrb[56].mxu0 %vm2018_vm6, %v2096_v19  ;;  %v2200_v23 = vpop.f32.mrb[56].mxu1  ;;  %v2024_v21 = vmax.f32 %v2022_v20, %v2023_v22 }
0x1bc9   :  { %v2209_v24 = vpack.c.bf16 %v2200_v23, %v2200_v23  ;;  %v2809_v26 = vpop.f32.mrb[57].mxu1  ;;  %2813 = vmatprep.mubr.msk.bf16.mxu0 %vm3276_vm3, %v3275_v9  ;;  %vm2349_vm3 = vcmask 122880  }
0x1bca   :  { %v2203_v32 = vpop.f32.mrb[58].mxu1  ;;  %v2025_v33 = vrot.slane %v2024_v21, 2 }
0x1bcb   :  { %v2216_v35 = vsel %vm2214_vm8, %v2209_v24, 0  ;;  %v2810_v16 = vpop.f32.mrb[59].mxu1 }
0x1bcc   :  { %2812 = vmatpush3.bf16.msra.mxu0 %v2216_v35  ;;  %v2026_v49 = vmax.f32 %v2024_v21, %v2025_v33 }
0x1bce   :  { %v2027_v50 = vrot.slane %v2026_v49, 1 }
0x1bd0   :  { %2814 = vmatmul.mubr.msk.bf16.vlgmr.msra.gmra.mrb[60].mxu0 %vm2210_vm9, %v2208_v18  ;;  %v2028_v30 = vmax.f32 %v2026_v49, %v2027_v50 }
0x1bd2   :  { %v2029_v9 = vsub.f32 %v2011_v4, %v2028_v30  ;;  %v2030_v37 = vsub.f32 %v2014_v14, %v2028_v30 }
0x1bd4   :  { %v2031_v38 = vmul.f32 1.442695, %v2029_v9  ;;  %v2033_v39 = vmul.f32 1.442695, %v2030_v37 }
0x1bd6   :  { %2984 = vpow2.f32 %v2031_v38 }
0x1bd7   :  { %2986 = vpow2.f32 %v2033_v39 }
0x1be0   :  { %v2985_v41 = vpop.eup %2984 }
0x1be1   :  { %v2987_v42 = vpop.eup %2986  ;;  %v2035_v43 = vsel %vm2018_vm6, %v2985_v41, 0.0 }
0x1be2   :  { %v2036_v44 = vsel %vm2020_vm7, %v2987_v42, 0.0 }
0x1be3   :  { %v2037_v51 = vadd.f32 %v2036_v44, %v2035_v43 }
0x1be5   :  { %v2038_v46 = vrot.slane %v2037_v51, 4 }
0x1be7   :  { %v2039_v45 = vadd.f32 %v2038_v46, %v2037_v51 }
0x1be9   :  { %v2040_v47 = vrot.slane %v2039_v45, 2 }
0x1beb   :  { %v2041_v25 = vadd.f32 %v2040_v47, %v2039_v45 }
0x1bed   :  { %v2042_v53 = vrot.slane %v2041_v25, 1 }
0x1bef   :  { %v2043_v48 = vadd.f32 %v2042_v53, %v2041_v25  ;;  %v2483_v53 = vadd.s32 4294967288, %v3952_v36 }
0x1bf1   :  { %2988 = vlog2.f32 %v2043_v48  ;;  %v2318_v31 = vrot.slane %v2483_v53, %v3967_v54 }
0x1bf3   :  { %vm2319_vm0 = vcmp.eq.s32.totalorder %v3961_v40, %v2318_v31 }
0x1bfb   :  { %v2989_v56 = vpop.eup %2988 }
0x1bfc   :  { %v2045_v57 = vmul.f32 0.6931472, %v2989_v56 }
0x1bfe   :  { %v2046_v58 = vsub.f32 %v2029_v9, %v2045_v57  ;;  %v2047_v34 = vsub.f32 %v2030_v37, %v2045_v57 }
0x1c00   :  { %v2303_v59 = vsel %vm2301_vm14, %v2046_v58, 0.0  ;;  %v2304_v60 = vsel %vm2302_vm15, %v2047_v34, 0.0 }
0x1c01   :  { %v2305_v61 = vsel %vm2018_vm6, %v2303_v59, 0.0  ;;  %v2306_v62 = vsel %vm2020_vm7, %v2304_v60, 0.0  ;;  %v2484_v60 = vadd.s32 4294967280, %v3952_v36 }
0x1c02   :  { %v3980_v63 = vadd.f32 %v2306_v62, %v2305_v61 }
0x1c03   :  { %v2332_v62 = vrot.slane %v2484_v60, %v3967_v54 }
0x1c05   :  { %vm2333_vm1 = vcmp.eq.s32.totalorder %v3961_v40, %v2332_v62  ;;  %vm2334_vm2 = vcmp.eq.s32.totalorder %v3973_v55, %v2332_v62 }
0x1c9b   :  { %v2135_v1 = vpop.f32.mrb[56].mxu0 }
0x1c9c   :  { %v2141_v2 = vsel %vm2018_vm6, %v2135_v1, -inf  ;;  %v2803_v3 = vpop.f32.mrb[57].mxu0 }
0x1c9d   :  { %v2142_v4 = vrot.slane %v2141_v2, 4  ;;  %v2138_v5 = vpop.f32.mrb[58].mxu0  ;;  %v2308_v3 = vrot.slane %v3980_v63, 4 }
0x1c9e   :  { %v2804_v6 = vpop.f32.mrb[59].mxu0 }
0x1c9f   :  { %v2143_v8 = vmax.f32 %v2141_v2, %v2142_v4 }
0x1ca1   :  { %v2144_v12 = vrot.slane %v2143_v8, 2 }
0x1ca3   :  { %v2145_v13 = vmax.f32 %v2143_v8, %v2144_v12  ;;  %v2252_v14 = vpop.f32.mrb[60].mxu0  ;;  %v2309_v12 = vadd.f32 %v2308_v3, %v3980_v63 }
0x1ca4   :  { %v2815_v7 = vpop.f32.mrb[61].mxu0  ;;  %v2259_v17 = vsel %vm2018_vm6, %v2252_v14, -inf }
0x1ca5   :  { %v2146_v15 = vrot.slane %v2145_v13, 1  ;;  %v2255_v10 = vpop.f32.mrb[62].mxu0 }
0x1ca6   :  { %v2260_v19 = vsel %vm2018_vm6, %v2255_v10, -inf  ;;  %v2816_v20 = vpop.f32.mrb[63].mxu0 }
0x1ca7   :  { %v2147_v22 = vmax.f32 %v2145_v13, %v2146_v15  ;;  %v2261_v23 = vmax.f32 %v2259_v17, %v2260_v19  ;;  %v2310_v19 = vrot.slane %v2309_v12, 2 }
0x1ca9   :  { %v2148_v21 = vsub.f32 %v2135_v1, %v2147_v22  ;;  %v2262_v24 = vrot.slane %v2261_v23, 4 }
0x1cab   :  { %v2149_v26 = vmul.f32 1.442695, %v2148_v21  ;;  %v2263_v27 = vmax.f32 %v2261_v23, %v2262_v24  ;;  %v2311_v23 = vadd.f32 %v2310_v19, %v2309_v12 }
0x1cad   :  { %2990 = vpow2.f32 %v2149_v26  ;;  %v2264_v29 = vrot.slane %v2263_v27, 2  ;;  %v2312_v24 = vrot.slane %v2311_v23, 1 }
0x1caf   :  { %v2265_v32 = vmax.f32 %v2263_v27, %v2264_v29  ;;  %v2313_v29 = vadd.f32 %v2312_v24, %v2311_v23 }
0x1cb1   :  { %v2266_v33 = vrot.slane %v2265_v32, 1 }
0x1cb3   :  { %v2267_v35 = vmax.f32 %v2265_v32, %v2266_v33 }
0x1cb5   :  { %v2268_v16 = vsub.f32 %v2252_v14, %v2267_v35  ;;  %v2269_v18 = vsub.f32 %v2255_v10, %v2267_v35 }
0x1cb7   :  { %v2991_v49 = vpop.eup %2990  ;;  %v2270_v50 = vmul.f32 1.442695, %v2268_v16  ;;  %v2272_v30 = vmul.f32 1.442695, %v2269_v18 }
0x1cb8   :  { %v2151_v9 = vsel %vm2018_vm6, %v2991_v49, 0.0 }
0x1cb9   :  { %v2152_v37 = vrot.slane %v2151_v9, 4  ;;  %2992 = vpow2.f32 %v2270_v50 }
0x1cba   :  { %2994 = vpow2.f32 %v2272_v30 }
0x1cbb   :  { %v2153_v38 = vadd.f32 %v2152_v37, %v2151_v9 }
0x1cbd   :  { %v2154_v39 = vrot.slane %v2153_v38, 2 }
0x1cbf   :  { %v2155_v41 = vadd.f32 %v2154_v39, %v2153_v38 }
0x1cc1   :  { %v2156_v42 = vrot.slane %v2155_v41, 1 }
0x1cc3   :  { %v2993_v43 = vpop.eup %2992  ;;  %v2157_v44 = vadd.f32 %v2156_v42, %v2155_v41 }
0x1cc4   :  { %v2995_v51 = vpop.eup %2994  ;;  %v2274_v46 = vsel %vm2018_vm6, %v2993_v43, 0.0 }
0x1cc5   :  { %2996 = vlog2.f32 %v2157_v44  ;;  %v2275_v45 = vsel %vm2018_vm6, %v2995_v51, 0.0 }
0x1cc6   :  { %v2276_v47 = vadd.f32 %v2275_v45, %v2274_v46 }
0x1cc8   :  { %v2277_v25 = vrot.slane %v2276_v47, 4 }
0x1cca   :  { %v2278_v48 = vadd.f32 %v2277_v25, %v2276_v47 }
0x1ccc   :  { %v2279_v28 = vrot.slane %v2278_v48, 2 }
0x1cce   :  { %v2280_v0 = vadd.f32 %v2279_v28, %v2278_v48 }
0x1ccf   :  { %v2997_v11 = vpop.eup %2996 }
0x1cd0   :  { %v2159_v56 = vmul.f32 0.6931472, %v2997_v11  ;;  %v2281_v57 = vrot.slane %v2280_v0, 1 }
0x1cd2   :  { %v2160_v58 = vsub.f32 %v2148_v21, %v2159_v56  ;;  %v2282_v34 = vadd.f32 %v2281_v57, %v2280_v0 }
0x1cd4   :  { %v2320_v59 = vsel %vm2319_vm0, %v2160_v58, 0.0  ;;  %2998 = vlog2.f32 %v2282_v34 }
0x1cd5   :  { %v2321_v61 = vsel %vm2018_vm6, %v2320_v59, 0.0 }
0x1cd6   :  { %v2322_v1 = vrot.slane %v2321_v61, 4 }
0x1cd8   :  { %v2323_v5 = vadd.f32 %v2322_v1, %v2321_v61 }
0x1cda   :  { %v2324_v15 = vrot.slane %v2323_v5, 2 }
0x1cdc   :  { %v2325_v20 = vadd.f32 %v2324_v15, %v2323_v5 }
0x1cde   :  { %v2999_v2 = vpop.eup %2998  ;;  %v2326_v55 = vrot.slane %v2325_v20, 1 }
0x1cdf   :  { %v2284_v4 = vmul.f32 0.6931472, %v2999_v2 }
0x1ce0   :  { %v2327_v27 = vadd.f32 %v2326_v55, %v2325_v20 }
0x1ce1   :  { %v2285_v6 = vsub.f32 %v2268_v16, %v2284_v4  ;;  %v2286_v8 = vsub.f32 %v2269_v18, %v2284_v4 }
0x1ce3   :  { %v2335_v13 = vsel %vm2333_vm1, %v2285_v6, 0.0  ;;  %v2336_v14 = vsel %vm2334_vm2, %v2286_v8, 0.0 }
0x1ce4   :  { %v2337_v7 = vsel %vm2018_vm6, %v2335_v13, 0.0  ;;  %v2338_v54 = vsel %vm2018_vm6, %v2336_v14, 0.0 }
0x1ce5   :  { %v2339_v10 = vadd.f32 %v2338_v54, %v2337_v7 }
0x1ce7   :  { %v2340_v17 = vrot.slane %v2339_v10, 4 }
0x1ce9   :  { %v2341_v22 = vadd.f32 %v2340_v17, %v2339_v10 }
0x1ceb   :  { %v2342_v40 = vrot.slane %v2341_v22, 2 }
0x1ced   :  { %v2343_v21 = vadd.f32 %v2342_v40, %v2341_v22 }
0x1cef   :  { %v2344_v26 = vrot.slane %v2343_v21, 1 }
0x1cf1   :  { %v2345_v63 = vadd.f32 %v2344_v26, %v2343_v21 }
0x1cf3   :  { %v2346_v32 = vsel %vm3956_vm12, %v2327_v27, %v2345_v63 }
0x1cf4   :  { %v2347_v33 = vsel %vm2288_vm13, 0.0, %v2346_v32 }
0x1cf5   :  { %v2348_v35 = vadd.f32 %v2347_v33, %v2313_v29 }
0x1cf7   :  { %v2351_v16 = vsub.f32 0.0, %v2348_v35  ;;  %2350 = vst.msk [vmem:[#allocation15] sm:$0x1] %vm2349_vm3, %v2348_v35 }
0x1cf9   :  { %v2352_v18 = vsel %vm2349_vm3, %v2351_v16, 0.0 }
0x1cfa   :  { %2353 = vadd.xlane.f32.xlu1 %v2352_v18 }
0x1cfb   :  { %3172 = shalt.err (!%p3169_p4)
}
0x1cfc   :  { %s3173_s22 = scalar_lea.hbm %s4081_s16, 16 }
0x1cfd   :  { %p3174_p5 = scmp.ne.s32.totalorder %s4081_s16, %s3173_s22  ;;  %p3177_p6 = scmp.lt.u32.totalorder %s3173_s22, %s4081_s16 }
0x1cff   :  { %p3179_p7 = pnand %p3177_p6, %p3174_p5 }
0x1d01   :  { %3182 = shalt.err (!%p3179_p7)
}
0x1d02   :  { %2367 = dma.vmem_to_hbm [thread:$0]  %s2365_s20, 16, %s4081_s16, [#allocation5]  }
0x1d03   :  { %s3281_s24 = smov [#allocation19]  }
0x1d04   :  { %s2395_s13 = sshll.u32 %s3281_s24, 4  ;;  %s2396_s13 = int_to_ptr.vmem [resolvable:$true] %s2395_s13 }
0x1d05   :  { %s3183_s29 = scalar_lea.vmem %s2396_s13, 64  ;;  %p3188_p9 = scmp.lt.s32.totalorder %s2396_s13, %s2396_s13 }
0x1d06   :  { %p3184_p8 = scmp.ne.s32.totalorder %s2396_s13, %s3183_s29  ;;  %p3189_p10 = scmp.lt.s32.totalorder %s3183_s29, %s3183_s29 }
0x1d08   :  { %p3190_p11 = por %p3189_p10, %p3188_p9 }
0x1d0a   :  { %p3191_p12 = pnand %p3190_p11, %p3184_p8 }
0x1d0c   :  { %3194 = shalt.err (!%p3191_p12)
}
0x1d0d   :  { %s3195_s6 = scalar_lea.hbm %s4084_s19, 64 }
0x1d0e   :  { %p3196_p13 = scmp.ne.s32.totalorder %s4084_s19, %s3195_s6  ;;  %p3199_p0 = scmp.lt.u32.totalorder %s3195_s6, %s4084_s19 }
0x1d10   :  { %p3201_p1 = pnand %p3199_p0, %p3196_p13 }
0x1d12   :  { %3204 = shalt.err (!%p3201_p1)
}
0x1d13   :  { %s3282_s26 = smov 2   ;;  %s3283_s27 = smov [#allocation16]   ;;  %vm2356_vm4 = vcmask 0  }
0x1d14   :  { %2401 = dma.vmem_to_hbm [thread:$0]  %s2396_s13, 64, %s4084_s19, [#allocation20], %s3277_s14, %s3277_s14, %s3282_s26  }
0x1d15   :  { %s2374_s28 = sshll.u32 %s3283_s27, 4  ;;  %s3284_s20 = smov [#allocation18]   ;;  %s2375_s28 = int_to_ptr.vmem [resolvable:$true] %s2374_s28 }
0x1d16   :  { %s2383_s1 = sshll.u32 %s3284_s20, 4  ;;  %s3205_s8 = scalar_lea.vmem %s2375_s28, 16  ;;  %s4031_s1 = int_to_ptr.vmem [resolvable:$true] %s2383_s1 }
0x1d17   :  { %p3206_p2 = scmp.ne.s32.totalorder %s2375_s28, %s3205_s8  ;;  %s3209_s11 = scalar_lea.vmem %s2375_s28, 32 }
0x1d18   :  { %p3210_p3 = scmp.lt.s32.totalorder %s2375_s28, %s2375_s28  ;;  %p3211_p4 = scmp.lt.s32.totalorder %s3209_s11, %s3205_s8 }
0x1d1a   :  { %p3212_p5 = por %p3211_p4, %p3210_p3 }
0x1d1c   :  { %p3213_p6 = pnand %p3212_p5, %p3206_p2 }
0x1d87   :  { %v2354_v36 = vpop.xlane.xlu1 %2353 }
0x1d88   :  { %v2355_v52 = vmul.f32 0.0625, %v2354_v36 }
0x1d8a   :  { %2357 = vst.msk [vmem:[#allocation16] sm:$0x1] %vm2356_vm4, %v2355_v52 }
0x1d8b   :  { %3216 = shalt.err (!%p3213_p6)
}
0x1d8c   :  { %s3217_s22 = scalar_lea.hbm %s4082_s17, 16 }
0x1d8d   :  { %p3218_p7 = scmp.ne.s32.totalorder %s4082_s17, %s3217_s22  ;;  %p3221_p8 = scmp.lt.u32.totalorder %s3217_s22, %s4082_s17 }
0x1d8f   :  { %p3223_p9 = pnand %p3221_p8, %p3218_p7 }
0x1d91   :  { %3226 = shalt.err (!%p3223_p9)
}
0x1d92   :  { %2377 = dma.vmem_to_hbm [thread:$0]  %s2375_s28, 16, %s4082_s17, [#allocation17]  }
0x1d93   :  { %s3227_s24 = scalar_lea.vmem %s4031_s1, 64  ;;  %p3232_p11 = scmp.lt.s32.totalorder %s4031_s1, %s4031_s1 }
0x1d94   :  { %p3228_p10 = scmp.ne.s32.totalorder %s4031_s1, %s3227_s24  ;;  %p3233_p12 = scmp.lt.s32.totalorder %s3227_s24, %s3227_s24 }
0x1d96   :  { %p3234_p13 = por %p3233_p12, %p3232_p11 }
0x1d98   :  { %p3235_p0 = pnand %p3234_p13, %p3228_p10 }
0x1d9a   :  { %3238 = shalt.err (!%p3235_p0)
}
0x1d9b   :  { %s3239_s4 = scalar_lea.hbm %s4083_s18, 64 }
0x1d9c   :  { %p3240_p1 = scmp.ne.s32.totalorder %s4083_s18, %s3239_s4  ;;  %p3243_p2 = scmp.lt.u32.totalorder %s3239_s4, %s4083_s18 }
0x1d9e   :  { %p3245_p3 = pnand %p3243_p2, %p3240_p1 }
0x1da0   :  { %3248 = shalt.err (!%p3245_p3)
}
0x1da1   :  { %2389 = dma.vmem_to_hbm [thread:$0]  %s4031_s1, 64, %s4083_s18, [#allocation17], %s3277_s14, %s3277_s14, %s3282_s26  }
0x1da2   :  { %3257 = dma.done.wait [#allocation5], 16  }
0x1da3   :  { %3258 = vsyncadd [#allocation5], 4294967280 }
0x1da4   :  { %3259 = dma.done.wait [#allocation17], 80  }
0x1da5   :  { %3260 = vsyncadd [#allocation17], 4294967216 }
0x1da6   :  { %3261 = dma.done.wait [#allocation20], 64  }
0x1da7   :  { %3262 = vsyncadd [#allocation20], 4294967232 }
0x1da8   :  { %2414 = vsyncpa [#allocation4], 1 }
0x1da9   :  { %2415 = vsyncpa [#allocation7], 1 }
0x1daa   :  { %2416 = vsyncpa [#allocation10], 1 }
0x1dab   :  { %2417 = vsyncpa [#allocation13], 1 }
0x1dac   :  { %2418 = vsyncpa [#allocation5], 1 }
0x1dad   :  { %2419 = vsyncpa [#allocation17], 1 }
0x1dae   :  { %2420 = vsyncpa [#allocation20], 1 }

</bundles_post_ra>
